<compile_context>
chip_gen: v6e
topology: v6e:2x2x1
jax: 0.10.0
libtpu: 0.0.40
codegen_flags: <defaults>
</compile_context>

<pallas_src>
import math

import jax
import jax.numpy as jnp
from jax import lax
from jax.experimental import pallas as pl
from jax.experimental.pallas import tpu as pltpu

# ----------------------------- configuration -------------------------------
N_BATCH = 2
P_PROP = 8          # num_proposals
C_IN = 32           # in_channels
C_OUT = 32          # out_channels (== C_IN, required by the mask-feat reshape)
FEAT = 32           # kernel-updator feat_channels (== in_channels, see knet_head)
FFN_DIM = 64        # feedforward_channels
HEADS = 4           # num_heads
H = W = 16
K = 1               # conv_kernel_size
KK = K * K
E_DIM = C_IN * KK   # attention embed dim
DH = E_DIM // HEADS # per-head dim
NUM_MASK_FCS = 3
LN_EPS = 1e-5

# ---- packed weight indexing -------------------------------------------------
# fc_w stack: (N_FC, 32, 32)
FC_DYN_IN, FC_DYN_OUT, FC_INP_IN, FC_INP_OUT = 0, 1, 2, 3
FC_GATE_IN, FC_GATE_UP, FC_LAYER, FC_ATTN_OUT = 4, 5, 6, 7
FC_MASK0 = 8                       # 8, 9, 10 -> the three mask FCs (bias-free)
FC_MASK = 11                       # fc_mask
N_FC = 12

# vec_w stack: (N_VEC, 32) = [10 biases | 10 LN gammas | 10 LN betas]
B_DYN_IN, B_DYN_OUT, B_INP_IN, B_INP_OUT = 0, 1, 2, 3
B_GATE_IN, B_GATE_UP, B_FC_LAYER, B_ATTN_OUT = 4, 5, 6, 7
B_FFN2, B_FC_MASK = 8, 9
N_BIAS = 10
LN_INORM_IN, LN_NORM_IN, LN_NORM_OUT, LN_INORM_OUT = 0, 1, 2, 3
LN_FC_NORM, LN_ATTN, LN_FFN = 4, 5, 6
LN_MASK0 = 7                       # 7, 8, 9
N_LN = 10
N_VEC = N_BIAS + 2 * N_LN

WEIGHT_NAMES = ("fc_w", "vec_w", "qkv_w", "qkv_b", "ffn1_w", "ffn1_b", "ffn2_w")


# ----------------------------- fused pallas kernel ---------------------------
def _fused_head_kernel(mask_ref, x_ref, prop_ref,
                       fc_ref, vec_ref, qkv_w_ref, qkv_b_ref,
                       ffn1_w_ref, ffn1_b_ref, ffn2_w_ref,
                       newmask_ref, obj_out_ref):
    f32 = jnp.float32
    bf16 = jnp.bfloat16

    def dot(a, b):
        return jnp.dot(a, b, preferred_element_type=f32)

    def fcw(i):                       # static leading-axis index -> (32, 32)
        return fc_ref[i]

    def vec(i):                       # static row -> (1, 32)
        return vec_ref[pl.ds(i, 1), :]

    def layer_norm(y, i):
        mu = jnp.mean(y, axis=-1, keepdims=True)
        var = jnp.mean(jnp.square(y - mu), axis=-1, keepdims=True)
        g = vec(N_BIAS + i)
        b = vec(N_BIAS + N_LN + i)
        return (y - mu) * lax.rsqrt(var + LN_EPS) * g + b

    # ---- softmax over proposals + einsum('phw,chw->pc') ---------------------
    mask = mask_ref[0]                                     # (P, HW)
    m = mask - jnp.max(mask, axis=0, keepdims=True)
    e = jnp.exp(m)
    sm = e * pl.reciprocal(jnp.sum(e, axis=0, keepdims=True), approx=True)
    x_feat = lax.dot_general(
        sm.astype(bf16), x_ref[0].astype(bf16),
        (((1,), (1,)), ((), ())), preferred_element_type=f32)   # (P, C)

    prop = prop_ref[0]                                     # (P, C)

    # ---- KernelUpdator (DynamicConv) ----------------------------------------
    param_in = dot(x_feat, fcw(FC_DYN_IN)) + vec(B_DYN_IN)
    param_out = dot(x_feat, fcw(FC_DYN_OUT)) + vec(B_DYN_OUT)
    input_in = dot(prop, fcw(FC_INP_IN)) + vec(B_INP_IN)
    input_out = dot(prop, fcw(FC_INP_OUT)) + vec(B_INP_OUT)

    gate_feats = input_in * param_in
    input_gate = jax.nn.sigmoid(
        layer_norm(dot(gate_feats, fcw(FC_GATE_IN)) + vec(B_GATE_IN), LN_INORM_IN))
    update_gate = jax.nn.sigmoid(
        layer_norm(dot(gate_feats, fcw(FC_GATE_UP)) + vec(B_GATE_UP), LN_NORM_IN))

    param_out = layer_norm(param_out, LN_NORM_OUT)
    input_out = layer_norm(input_out, LN_INORM_OUT)

    features = update_gate * param_out + input_gate * input_out
    features = dot(features, fcw(FC_LAYER)) + vec(B_FC_LAYER)
    obj = jnp.maximum(layer_norm(features, LN_FC_NORM), 0.0)   # (P, E)

    # ---- multi-head self-attention (fused QKV proj, residual + LN) ----------
    # 1/sqrt(DH) query scale is folded into qkv_w / qkv_b at init time.
    qkv = dot(obj, qkv_w_ref[...]) + qkv_b_ref[...]            # (P, 3E)
    q = qkv[:, :E_DIM]
    k = qkv[:, E_DIM:2 * E_DIM]
    v = qkv[:, 2 * E_DIM:]

    lane = lax.broadcasted_iota(jnp.int32, (P_PROP, E_DIM), 1)
    ctx = jnp.zeros((P_PROP, E_DIM), f32)
    for h in range(HEADS):
        hm = (lane >= h * DH) & (lane < (h + 1) * DH)
        qh = jnp.where(hm, q, 0.0)                             # only head-h lanes
        s = lax.dot_general(qh, k, (((1,), (1,)), ((), ())),
                            preferred_element_type=f32)        # (P, P) == q_h.k_h^T
        s = s - jnp.max(s, axis=-1, keepdims=True)
        p = jnp.exp(s)
        p = p * pl.reciprocal(jnp.sum(p, axis=-1, keepdims=True), approx=True)
        ctx = ctx + dot(p, jnp.where(hm, v, 0.0))              # lands in head-h lanes
    attn = dot(ctx, fcw(FC_ATTN_OUT)) + vec(B_ATTN_OUT)        # single out-projection
    obj = layer_norm(obj + attn, LN_ATTN)

    # ---- FFN with residual + LN ----------------------------------------------
    hid = jnp.maximum(dot(obj, ffn1_w_ref[...]) + ffn1_b_ref[...], 0.0)
    hid = dot(hid, ffn2_w_ref[...]) + vec(B_FFN2)
    obj = layer_norm(obj + hid, LN_FFN)

    obj_out_ref[0] = obj                                       # (P, E)

    # ---- mask FCs + fc_mask ----------------------------------------------------
    mf = obj
    for i in range(NUM_MASK_FCS):
        mf = dot(mf, fcw(FC_MASK0 + i))                        # bias-free Linear
        mf = jnp.maximum(layer_norm(mf, LN_MASK0 + i), 0.0)
    mf = dot(mf, fcw(FC_MASK)) + vec(B_FC_MASK)                # (P, C_OUT)

    # ---- dynamic 1x1 conv of the feature map with predicted kernels -----------
    # Re-read x here (instead of keeping it live from the gather) to bound its
    # vreg live range; bf16 operands, f32 accumulation.
    newmask_ref[0] = jnp.dot(mf.astype(bf16), x_ref[0].astype(bf16),
                             preferred_element_type=f32)       # (P, HW)


# ----------------------------- forward wrapper --------------------------------
def kernel_update_head_forward(params, x, proposal_feat, mask_preds):
    nb, pn = proposal_feat.shape[:2]
    cc, hh, ww = x.shape[-3:]
    hw = hh * ww

    mask2 = mask_preds.reshape(nb, pn, hw)
    x2 = x.reshape(nb, cc, hw)
    prop2 = proposal_feat.reshape(nb, pn, C_IN * KK)

    weights = [params[name] for name in WEIGHT_NAMES]

    def const_spec(arr):
        return pl.BlockSpec(arr.shape, lambda b, nd=arr.ndim: (0,) * nd)

    in_specs = [
        pl.BlockSpec((1, pn, hw), lambda b: (b, 0, 0)),          # mask_preds
        pl.BlockSpec((1, cc, hw), lambda b: (b, 0, 0)),          # x feature map
        pl.BlockSpec((1, pn, C_IN * KK), lambda b: (b, 0, 0)),   # proposal_feat
    ] + [const_spec(a) for a in weights]

    out_specs = [
        pl.BlockSpec((1, pn, hw), lambda b: (b, 0, 0)),
        pl.BlockSpec((1, pn, C_IN * KK), lambda b: (b, 0, 0)),
    ]
    out_shapes = [
        jax.ShapeDtypeStruct((nb, pn, hw), jnp.float32),
        jax.ShapeDtypeStruct((nb, pn, C_IN * KK), jnp.float32),
    ]

    new_mask, obj = pl.pallas_call(
        _fused_head_kernel,
        grid=(nb,),
        in_specs=in_specs,
        out_specs=out_specs,
        out_shape=out_shapes,
        compiler_params=pltpu.CompilerParams(
            dimension_semantics=("parallel",)),
    )(mask2, x2, prop2, *weights)

    new_mask_preds = new_mask.reshape(nb, pn, hh, ww)
    dyn_kernels = obj.reshape(nb, pn, C_IN, K, K)
    return new_mask_preds, dyn_kernels


# ----------------------------- parameters -----------------------------------
def init_params(key):
    # NOTE: layouts are (in, out) applied as x @ W with a custom packing; an
    # exact repack is required to load real PyTorch KernelUpdateHead weights.
    keys = iter(jax.random.split(key, 16))

    def nrm(shape, scale):
        return scale * jax.random.normal(next(keys), shape, jnp.float32)

    p = {}
    # 12 stacked (32,32) FC weights (dyn_in/out, inp_in/out, gate_in/up,
    # fc_layer, attn_out, 3 mask FCs, fc_mask)
    p["fc_w"] = nrm((N_FC, C_IN, C_IN), 1.0 / math.sqrt(C_IN))

    # vector stack: 10 biases, 10 LN gammas, 10 LN betas
    biases = nrm((N_BIAS, C_IN), 0.01)
    gammas = 1.0 + nrm((N_LN, C_IN), 0.1)
    betas = nrm((N_LN, C_IN), 0.1)
    p["vec_w"] = jnp.concatenate([biases, gammas, betas], axis=0)   # (30, 32)

    # fused QKV projection; fold the 1/sqrt(DH) query scale into the q columns
    qkv_w = nrm((E_DIM, 3 * E_DIM), 1.0 / math.sqrt(E_DIM))
    qkv_b = nrm((1, 3 * E_DIM), 0.01)
    scale = 1.0 / math.sqrt(DH)
    col_scale = jnp.where(jnp.arange(3 * E_DIM) < E_DIM, scale, 1.0).astype(jnp.float32)
    p["qkv_w"] = qkv_w * col_scale[None, :]
    p["qkv_b"] = qkv_b * col_scale[None, :]

    # FFN
    p["ffn1_w"] = nrm((C_IN, FFN_DIM), 1.0 / math.sqrt(C_IN))
    p["ffn1_b"] = nrm((1, FFN_DIM), 0.01)
    p["ffn2_w"] = nrm((FFN_DIM, C_IN), 1.0 / math.sqrt(FFN_DIM))
    return p


# ----------------------------- main -------------------------------------------
if __name__ == "__main__":
    key = jax.random.PRNGKey(0)
    kx, kp, km, kw = jax.random.split(key, 4)
    x = jax.random.normal(kx, (N_BATCH, C_IN, H, W), jnp.float32)
    proposal_feat = jax.random.normal(kp, (N_BATCH, P_PROP, C_IN * KK), jnp.float32)
    mask_preds = jax.random.normal(km, (N_BATCH, P_PROP, H, W), jnp.float32)
    params = init_params(kw)

    fwd = jax.jit(kernel_update_head_forward)
    new_masks, dyn_kernels = fwd(params, x, proposal_feat, mask_preds)
    jax.block_until_ready((new_masks, dyn_kernels))

    assert new_masks.shape == (N_BATCH, P_PROP, H, W)
    assert dyn_kernels.shape == (N_BATCH, P_PROP, C_IN, K, K)
    assert bool(jnp.all(jnp.isfinite(new_masks))) and bool(jnp.all(jnp.isfinite(dyn_kernels)))
    print("KERNEL_OK")
</pallas_src>

<mosaic_0001>
module attributes {stable_mosaic.version = 11 : i64} {
  func.func @_fused_head_kernel(%arg0: i32, %arg1: memref<1x8x256xf32, #tpu.memory_space<vmem>>, %arg2: memref<1x32x256xf32, #tpu.memory_space<vmem>>, %arg3: memref<1x8x32xf32, #tpu.memory_space<vmem>>, %arg4: memref<12x32x32xf32, #tpu.memory_space<vmem>>, %arg5: memref<30x32xf32, #tpu.memory_space<vmem>>, %arg6: memref<32x96xf32, #tpu.memory_space<vmem>>, %arg7: memref<1x96xf32, #tpu.memory_space<vmem>>, %arg8: memref<32x64xf32, #tpu.memory_space<vmem>>, %arg9: memref<1x64xf32, #tpu.memory_space<vmem>>, %arg10: memref<64x32xf32, #tpu.memory_space<vmem>>, %arg11: memref<1x8x256xf32, #tpu.memory_space<vmem>>, %arg12: memref<1x8x32xf32, #tpu.memory_space<vmem>>) attributes {dimension_semantics = [#tpu.dimension_semantics<parallel>], iteration_bounds = array<i64: 2>, scalar_prefetch = 0 : i64, scratch_operands = 0 : i64, tpu.core_type = #tpu.core_type<tc>, window_params = [{transform_indices = @transform_0, window_bounds = array<i64: 1, 8, 256>}, {transform_indices = @transform_1, window_bounds = array<i64: 1, 32, 256>}, {transform_indices = @transform_2, window_bounds = array<i64: 1, 8, 32>}, {pipeline_mode = #tpu.pipeline_mode<synchronous>, transform_indices = @transform_3, window_bounds = array<i64: 12, 32, 32>}, {pipeline_mode = #tpu.pipeline_mode<synchronous>, transform_indices = @transform_4, window_bounds = array<i64: 30, 32>}, {pipeline_mode = #tpu.pipeline_mode<synchronous>, transform_indices = @transform_5, window_bounds = array<i64: 32, 96>}, {pipeline_mode = #tpu.pipeline_mode<synchronous>, transform_indices = @transform_6, window_bounds = array<i64: 1, 96>}, {pipeline_mode = #tpu.pipeline_mode<synchronous>, transform_indices = @transform_7, window_bounds = array<i64: 32, 64>}, {pipeline_mode = #tpu.pipeline_mode<synchronous>, transform_indices = @transform_8, window_bounds = array<i64: 1, 64>}, {pipeline_mode = #tpu.pipeline_mode<synchronous>, transform_indices = @transform_9, window_bounds = array<i64: 64, 32>}, {transform_indices = @transform_10, window_bounds = array<i64: 1, 8, 256>}, {transform_indices = @transform_11, window_bounds = array<i64: 1, 8, 32>}]} {
    %c0 = arith.constant 0 : index
    %c0_0 = arith.constant 0 : index
    %c0_1 = arith.constant 0 : index
    %0 = vector.load %arg1[%c0, %c0_0, %c0_1] : memref<1x8x256xf32, #tpu.memory_space<vmem>>, vector<1x8x256xf32>
    %1 = vector.shape_cast %0 : vector<1x8x256xf32> to vector<8x256xf32>
    %cst = arith.constant dense<0xFF800000> : vector<256xf32>
    %2 = vector.multi_reduction <maximumf>, %1, %cst [0] : vector<8x256xf32> to vector<256xf32>
    %3 = vector.shape_cast %2 : vector<256xf32> to vector<1x256xf32>
    %4 = vector.broadcast %3 : vector<1x256xf32> to vector<8x256xf32>
    %5 = arith.subf %1, %4 : vector<8x256xf32>
    %6 = math.exp %5 : vector<8x256xf32>
    %cst_2 = arith.constant dense<0.000000e+00> : vector<256xf32>
    %7 = vector.multi_reduction <add>, %6, %cst_2 [0] : vector<8x256xf32> to vector<256xf32>
    %8 = vector.shape_cast %7 : vector<256xf32> to vector<1x256xf32>
    %9 = tpu.reciprocal %8 {approx = true} : vector<1x256xf32> -> vector<1x256xf32>
    %10 = vector.broadcast %9 : vector<1x256xf32> to vector<8x256xf32>
    %11 = arith.mulf %6, %10 : vector<8x256xf32>
    %12 = arith.truncf %11 : vector<8x256xf32> to vector<8x256xbf16>
    %c0_3 = arith.constant 0 : index
    %c0_4 = arith.constant 0 : index
    %c0_5 = arith.constant 0 : index
    %13 = vector.load %arg2[%c0_3, %c0_4, %c0_5] : memref<1x32x256xf32, #tpu.memory_space<vmem>>, vector<1x32x256xf32>
    %14 = vector.shape_cast %13 : vector<1x32x256xf32> to vector<32x256xf32>
    %15 = arith.truncf %14 : vector<32x256xf32> to vector<32x256xbf16>
    %cst_6 = arith.constant dense<0.000000e+00> : vector<8x32xf32>
    %16 = tpu.matmul %12, %15, %cst_6 {dimension_numbers = #tpu.dot_dimension_numbers<[1], [1], [0], [0], [0, 0, 1, 0], [], []>} : vector<8x256xbf16>, vector<32x256xbf16>, vector<8x32xf32> -> vector<8x32xf32>
    %c0_7 = arith.constant 0 : index
    %c0_8 = arith.constant 0 : index
    %c0_9 = arith.constant 0 : index
    %17 = vector.load %arg3[%c0_7, %c0_8, %c0_9] : memref<1x8x32xf32, #tpu.memory_space<vmem>>, vector<1x8x32xf32>
    %18 = vector.shape_cast %17 : vector<1x8x32xf32> to vector<8x32xf32>
    %c0_10 = arith.constant 0 : index
    %c0_11 = arith.constant 0 : index
    %c0_12 = arith.constant 0 : index
    %19 = vector.load %arg4[%c0_10, %c0_11, %c0_12] : memref<12x32x32xf32, #tpu.memory_space<vmem>>, vector<1x32x32xf32>
    %20 = vector.shape_cast %19 : vector<1x32x32xf32> to vector<32x32xf32>
    %cst_13 = arith.constant dense<0.000000e+00> : vector<8x32xf32>
    %21 = tpu.matmul %16, %20, %cst_13 {dimension_numbers = #tpu.dot_dimension_numbers<[1], [0], [0], [1], [0, 0, 1, 1], [], []>} : vector<8x32xf32>, vector<32x32xf32>, vector<8x32xf32> -> vector<8x32xf32>
    %c0_14 = arith.constant 0 : index
    %c0_15 = arith.constant 0 : index
    %22 = vector.load %arg5[%c0_14, %c0_15] : memref<30x32xf32, #tpu.memory_space<vmem>>, vector<1x32xf32>
    %23 = vector.broadcast %22 : vector<1x32xf32> to vector<8x32xf32>
    %24 = arith.addf %21, %23 : vector<8x32xf32>
    %c1 = arith.constant 1 : index
    %c0_16 = arith.constant 0 : index
    %c0_17 = arith.constant 0 : index
    %25 = vector.load %arg4[%c1, %c0_16, %c0_17] : memref<12x32x32xf32, #tpu.memory_space<vmem>>, vector<1x32x32xf32>
    %26 = vector.shape_cast %25 : vector<1x32x32xf32> to vector<32x32xf32>
    %cst_18 = arith.constant dense<0.000000e+00> : vector<8x32xf32>
    %27 = tpu.matmul %16, %26, %cst_18 {dimension_numbers = #tpu.dot_dimension_numbers<[1], [0], [0], [1], [0, 0, 1, 1], [], []>} : vector<8x32xf32>, vector<32x32xf32>, vector<8x32xf32> -> vector<8x32xf32>
    %c1_19 = arith.constant 1 : index
    %c0_20 = arith.constant 0 : index
    %28 = vector.load %arg5[%c1_19, %c0_20] : memref<30x32xf32, #tpu.memory_space<vmem>>, vector<1x32xf32>
    %29 = vector.broadcast %28 : vector<1x32xf32> to vector<8x32xf32>
    %30 = arith.addf %27, %29 : vector<8x32xf32>
    %c2 = arith.constant 2 : index
    %c0_21 = arith.constant 0 : index
    %c0_22 = arith.constant 0 : index
    %31 = vector.load %arg4[%c2, %c0_21, %c0_22] : memref<12x32x32xf32, #tpu.memory_space<vmem>>, vector<1x32x32xf32>
    %32 = vector.shape_cast %31 : vector<1x32x32xf32> to vector<32x32xf32>
    %cst_23 = arith.constant dense<0.000000e+00> : vector<8x32xf32>
    %33 = tpu.matmul %18, %32, %cst_23 {dimension_numbers = #tpu.dot_dimension_numbers<[1], [0], [0], [1], [0, 0, 1, 1], [], []>} : vector<8x32xf32>, vector<32x32xf32>, vector<8x32xf32> -> vector<8x32xf32>
    %c2_24 = arith.constant 2 : index
    %c0_25 = arith.constant 0 : index
    %34 = vector.load %arg5[%c2_24, %c0_25] : memref<30x32xf32, #tpu.memory_space<vmem>>, vector<1x32xf32>
    %35 = vector.broadcast %34 : vector<1x32xf32> to vector<8x32xf32>
    %36 = arith.addf %33, %35 : vector<8x32xf32>
    %c3 = arith.constant 3 : index
    %c0_26 = arith.constant 0 : index
    %c0_27 = arith.constant 0 : index
    %37 = vector.load %arg4[%c3, %c0_26, %c0_27] : memref<12x32x32xf32, #tpu.memory_space<vmem>>, vector<1x32x32xf32>
    %38 = vector.shape_cast %37 : vector<1x32x32xf32> to vector<32x32xf32>
    %cst_28 = arith.constant dense<0.000000e+00> : vector<8x32xf32>
    %39 = tpu.matmul %18, %38, %cst_28 {dimension_numbers = #tpu.dot_dimension_numbers<[1], [0], [0], [1], [0, 0, 1, 1], [], []>} : vector<8x32xf32>, vector<32x32xf32>, vector<8x32xf32> -> vector<8x32xf32>
    %c3_29 = arith.constant 3 : index
    %c0_30 = arith.constant 0 : index
    %40 = vector.load %arg5[%c3_29, %c0_30] : memref<30x32xf32, #tpu.memory_space<vmem>>, vector<1x32xf32>
    %41 = vector.broadcast %40 : vector<1x32xf32> to vector<8x32xf32>
    %42 = arith.addf %39, %41 : vector<8x32xf32>
    %43 = arith.mulf %36, %24 : vector<8x32xf32>
    %c4 = arith.constant 4 : index
    %c0_31 = arith.constant 0 : index
    %c0_32 = arith.constant 0 : index
    %44 = vector.load %arg4[%c4, %c0_31, %c0_32] : memref<12x32x32xf32, #tpu.memory_space<vmem>>, vector<1x32x32xf32>
    %45 = vector.shape_cast %44 : vector<1x32x32xf32> to vector<32x32xf32>
    %cst_33 = arith.constant dense<0.000000e+00> : vector<8x32xf32>
    %46 = tpu.matmul %43, %45, %cst_33 {dimension_numbers = #tpu.dot_dimension_numbers<[1], [0], [0], [1], [0, 0, 1, 1], [], []>} : vector<8x32xf32>, vector<32x32xf32>, vector<8x32xf32> -> vector<8x32xf32>
    %c4_34 = arith.constant 4 : index
    %c0_35 = arith.constant 0 : index
    %47 = vector.load %arg5[%c4_34, %c0_35] : memref<30x32xf32, #tpu.memory_space<vmem>>, vector<1x32xf32>
    %48 = vector.broadcast %47 : vector<1x32xf32> to vector<8x32xf32>
    %49 = arith.addf %46, %48 : vector<8x32xf32>
    %cst_36 = arith.constant dense<0.000000e+00> : vector<8xf32>
    %50 = vector.multi_reduction <add>, %49, %cst_36 [1] : vector<8x32xf32> to vector<8xf32>
    %51 = vector.shape_cast %50 : vector<8xf32> to vector<8x1xf32>
    %cst_37 = arith.constant 3.200000e+01 : f32
    %52 = vector.broadcast %cst_37 : f32 to vector<8x1xf32>
    %53 = arith.divf %51, %52 : vector<8x1xf32>
    %54 = vector.broadcast %53 : vector<8x1xf32> to vector<8x32xf32>
    %55 = arith.subf %49, %54 : vector<8x32xf32>
    %56 = arith.mulf %55, %55 : vector<8x32xf32>
    %cst_38 = arith.constant dense<0.000000e+00> : vector<8xf32>
    %57 = vector.multi_reduction <add>, %56, %cst_38 [1] : vector<8x32xf32> to vector<8xf32>
    %58 = vector.shape_cast %57 : vector<8xf32> to vector<8x1xf32>
    %cst_39 = arith.constant 3.200000e+01 : f32
    %59 = vector.broadcast %cst_39 : f32 to vector<8x1xf32>
    %60 = arith.divf %58, %59 : vector<8x1xf32>
    %c10 = arith.constant 10 : index
    %c0_40 = arith.constant 0 : index
    %61 = vector.load %arg5[%c10, %c0_40] : memref<30x32xf32, #tpu.memory_space<vmem>>, vector<1x32xf32>
    %c20 = arith.constant 20 : index
    %c0_41 = arith.constant 0 : index
    %62 = vector.load %arg5[%c20, %c0_41] : memref<30x32xf32, #tpu.memory_space<vmem>>, vector<1x32xf32>
    %63 = vector.broadcast %53 : vector<8x1xf32> to vector<8x32xf32>
    %64 = arith.subf %49, %63 : vector<8x32xf32>
    %cst_42 = arith.constant 9.99999974E-6 : f32
    %65 = vector.broadcast %cst_42 : f32 to vector<8x1xf32>
    %66 = arith.addf %60, %65 : vector<8x1xf32>
    %67 = math.rsqrt %66 : vector<8x1xf32>
    %68 = vector.broadcast %67 : vector<8x1xf32> to vector<8x32xf32>
    %69 = arith.mulf %64, %68 : vector<8x32xf32>
    %70 = vector.broadcast %61 : vector<1x32xf32> to vector<8x32xf32>
    %71 = arith.mulf %69, %70 : vector<8x32xf32>
    %72 = vector.broadcast %62 : vector<1x32xf32> to vector<8x32xf32>
    %73 = arith.addf %71, %72 : vector<8x32xf32>
    %74 = arith.negf %73 : vector<8x32xf32>
    %75 = math.exp %74 : vector<8x32xf32>
    %cst_43 = arith.constant 1.000000e+00 : f32
    %76 = vector.broadcast %cst_43 : f32 to vector<8x32xf32>
    %77 = arith.addf %76, %75 : vector<8x32xf32>
    %78 = arith.divf %76, %77 : vector<8x32xf32>
    %c5 = arith.constant 5 : index
    %c0_44 = arith.constant 0 : index
    %c0_45 = arith.constant 0 : index
    %79 = vector.load %arg4[%c5, %c0_44, %c0_45] : memref<12x32x32xf32, #tpu.memory_space<vmem>>, vector<1x32x32xf32>
    %80 = vector.shape_cast %79 : vector<1x32x32xf32> to vector<32x32xf32>
    %cst_46 = arith.constant dense<0.000000e+00> : vector<8x32xf32>
    %81 = tpu.matmul %43, %80, %cst_46 {dimension_numbers = #tpu.dot_dimension_numbers<[1], [0], [0], [1], [0, 0, 1, 1], [], []>} : vector<8x32xf32>, vector<32x32xf32>, vector<8x32xf32> -> vector<8x32xf32>
    %c5_47 = arith.constant 5 : index
    %c0_48 = arith.constant 0 : index
    %82 = vector.load %arg5[%c5_47, %c0_48] : memref<30x32xf32, #tpu.memory_space<vmem>>, vector<1x32xf32>
    %83 = vector.broadcast %82 : vector<1x32xf32> to vector<8x32xf32>
    %84 = arith.addf %81, %83 : vector<8x32xf32>
    %cst_49 = arith.constant dense<0.000000e+00> : vector<8xf32>
    %85 = vector.multi_reduction <add>, %84, %cst_49 [1] : vector<8x32xf32> to vector<8xf32>
    %86 = vector.shape_cast %85 : vector<8xf32> to vector<8x1xf32>
    %cst_50 = arith.constant 3.200000e+01 : f32
    %87 = vector.broadcast %cst_50 : f32 to vector<8x1xf32>
    %88 = arith.divf %86, %87 : vector<8x1xf32>
    %89 = vector.broadcast %88 : vector<8x1xf32> to vector<8x32xf32>
    %90 = arith.subf %84, %89 : vector<8x32xf32>
    %91 = arith.mulf %90, %90 : vector<8x32xf32>
    %cst_51 = arith.constant dense<0.000000e+00> : vector<8xf32>
    %92 = vector.multi_reduction <add>, %91, %cst_51 [1] : vector<8x32xf32> to vector<8xf32>
    %93 = vector.shape_cast %92 : vector<8xf32> to vector<8x1xf32>
    %cst_52 = arith.constant 3.200000e+01 : f32
    %94 = vector.broadcast %cst_52 : f32 to vector<8x1xf32>
    %95 = arith.divf %93, %94 : vector<8x1xf32>
    %c11 = arith.constant 11 : index
    %c0_53 = arith.constant 0 : index
    %96 = vector.load %arg5[%c11, %c0_53] : memref<30x32xf32, #tpu.memory_space<vmem>>, vector<1x32xf32>
    %c21 = arith.constant 21 : index
    %c0_54 = arith.constant 0 : index
    %97 = vector.load %arg5[%c21, %c0_54] : memref<30x32xf32, #tpu.memory_space<vmem>>, vector<1x32xf32>
    %98 = vector.broadcast %88 : vector<8x1xf32> to vector<8x32xf32>
    %99 = arith.subf %84, %98 : vector<8x32xf32>
    %cst_55 = arith.constant 9.99999974E-6 : f32
    %100 = vector.broadcast %cst_55 : f32 to vector<8x1xf32>
    %101 = arith.addf %95, %100 : vector<8x1xf32>
    %102 = math.rsqrt %101 : vector<8x1xf32>
    %103 = vector.broadcast %102 : vector<8x1xf32> to vector<8x32xf32>
    %104 = arith.mulf %99, %103 : vector<8x32xf32>
    %105 = vector.broadcast %96 : vector<1x32xf32> to vector<8x32xf32>
    %106 = arith.mulf %104, %105 : vector<8x32xf32>
    %107 = vector.broadcast %97 : vector<1x32xf32> to vector<8x32xf32>
    %108 = arith.addf %106, %107 : vector<8x32xf32>
    %109 = arith.negf %108 : vector<8x32xf32>
    %110 = math.exp %109 : vector<8x32xf32>
    %cst_56 = arith.constant 1.000000e+00 : f32
    %111 = vector.broadcast %cst_56 : f32 to vector<8x32xf32>
    %112 = arith.addf %111, %110 : vector<8x32xf32>
    %113 = arith.divf %111, %112 : vector<8x32xf32>
    %cst_57 = arith.constant dense<0.000000e+00> : vector<8xf32>
    %114 = vector.multi_reduction <add>, %30, %cst_57 [1] : vector<8x32xf32> to vector<8xf32>
    %115 = vector.shape_cast %114 : vector<8xf32> to vector<8x1xf32>
    %cst_58 = arith.constant 3.200000e+01 : f32
    %116 = vector.broadcast %cst_58 : f32 to vector<8x1xf32>
    %117 = arith.divf %115, %116 : vector<8x1xf32>
    %118 = vector.broadcast %117 : vector<8x1xf32> to vector<8x32xf32>
    %119 = arith.subf %30, %118 : vector<8x32xf32>
    %120 = arith.mulf %119, %119 : vector<8x32xf32>
    %cst_59 = arith.constant dense<0.000000e+00> : vector<8xf32>
    %121 = vector.multi_reduction <add>, %120, %cst_59 [1] : vector<8x32xf32> to vector<8xf32>
    %122 = vector.shape_cast %121 : vector<8xf32> to vector<8x1xf32>
    %cst_60 = arith.constant 3.200000e+01 : f32
    %123 = vector.broadcast %cst_60 : f32 to vector<8x1xf32>
    %124 = arith.divf %122, %123 : vector<8x1xf32>
    %c12 = arith.constant 12 : index
    %c0_61 = arith.constant 0 : index
    %125 = vector.load %arg5[%c12, %c0_61] : memref<30x32xf32, #tpu.memory_space<vmem>>, vector<1x32xf32>
    %c22 = arith.constant 22 : index
    %c0_62 = arith.constant 0 : index
    %126 = vector.load %arg5[%c22, %c0_62] : memref<30x32xf32, #tpu.memory_space<vmem>>, vector<1x32xf32>
    %127 = vector.broadcast %117 : vector<8x1xf32> to vector<8x32xf32>
    %128 = arith.subf %30, %127 : vector<8x32xf32>
    %cst_63 = arith.constant 9.99999974E-6 : f32
    %129 = vector.broadcast %cst_63 : f32 to vector<8x1xf32>
    %130 = arith.addf %124, %129 : vector<8x1xf32>
    %131 = math.rsqrt %130 : vector<8x1xf32>
    %132 = vector.broadcast %131 : vector<8x1xf32> to vector<8x32xf32>
    %133 = arith.mulf %128, %132 : vector<8x32xf32>
    %134 = vector.broadcast %125 : vector<1x32xf32> to vector<8x32xf32>
    %135 = arith.mulf %133, %134 : vector<8x32xf32>
    %136 = vector.broadcast %126 : vector<1x32xf32> to vector<8x32xf32>
    %137 = arith.addf %135, %136 : vector<8x32xf32>
    %cst_64 = arith.constant dense<0.000000e+00> : vector<8xf32>
    %138 = vector.multi_reduction <add>, %42, %cst_64 [1] : vector<8x32xf32> to vector<8xf32>
    %139 = vector.shape_cast %138 : vector<8xf32> to vector<8x1xf32>
    %cst_65 = arith.constant 3.200000e+01 : f32
    %140 = vector.broadcast %cst_65 : f32 to vector<8x1xf32>
    %141 = arith.divf %139, %140 : vector<8x1xf32>
    %142 = vector.broadcast %141 : vector<8x1xf32> to vector<8x32xf32>
    %143 = arith.subf %42, %142 : vector<8x32xf32>
    %144 = arith.mulf %143, %143 : vector<8x32xf32>
    %cst_66 = arith.constant dense<0.000000e+00> : vector<8xf32>
    %145 = vector.multi_reduction <add>, %144, %cst_66 [1] : vector<8x32xf32> to vector<8xf32>
    %146 = vector.shape_cast %145 : vector<8xf32> to vector<8x1xf32>
    %cst_67 = arith.constant 3.200000e+01 : f32
    %147 = vector.broadcast %cst_67 : f32 to vector<8x1xf32>
    %148 = arith.divf %146, %147 : vector<8x1xf32>
    %c13 = arith.constant 13 : index
    %c0_68 = arith.constant 0 : index
    %149 = vector.load %arg5[%c13, %c0_68] : memref<30x32xf32, #tpu.memory_space<vmem>>, vector<1x32xf32>
    %c23 = arith.constant 23 : index
    %c0_69 = arith.constant 0 : index
    %150 = vector.load %arg5[%c23, %c0_69] : memref<30x32xf32, #tpu.memory_space<vmem>>, vector<1x32xf32>
    %151 = vector.broadcast %141 : vector<8x1xf32> to vector<8x32xf32>
    %152 = arith.subf %42, %151 : vector<8x32xf32>
    %cst_70 = arith.constant 9.99999974E-6 : f32
    %153 = vector.broadcast %cst_70 : f32 to vector<8x1xf32>
    %154 = arith.addf %148, %153 : vector<8x1xf32>
    %155 = math.rsqrt %154 : vector<8x1xf32>
    %156 = vector.broadcast %155 : vector<8x1xf32> to vector<8x32xf32>
    %157 = arith.mulf %152, %156 : vector<8x32xf32>
    %158 = vector.broadcast %149 : vector<1x32xf32> to vector<8x32xf32>
    %159 = arith.mulf %157, %158 : vector<8x32xf32>
    %160 = vector.broadcast %150 : vector<1x32xf32> to vector<8x32xf32>
    %161 = arith.addf %159, %160 : vector<8x32xf32>
    %162 = arith.mulf %113, %137 : vector<8x32xf32>
    %163 = arith.mulf %78, %161 : vector<8x32xf32>
    %164 = arith.addf %162, %163 : vector<8x32xf32>
    %c6 = arith.constant 6 : index
    %c0_71 = arith.constant 0 : index
    %c0_72 = arith.constant 0 : index
    %165 = vector.load %arg4[%c6, %c0_71, %c0_72] : memref<12x32x32xf32, #tpu.memory_space<vmem>>, vector<1x32x32xf32>
    %166 = vector.shape_cast %165 : vector<1x32x32xf32> to vector<32x32xf32>
    %cst_73 = arith.constant dense<0.000000e+00> : vector<8x32xf32>
    %167 = tpu.matmul %164, %166, %cst_73 {dimension_numbers = #tpu.dot_dimension_numbers<[1], [0], [0], [1], [0, 0, 1, 1], [], []>} : vector<8x32xf32>, vector<32x32xf32>, vector<8x32xf32> -> vector<8x32xf32>
    %c6_74 = arith.constant 6 : index
    %c0_75 = arith.constant 0 : index
    %168 = vector.load %arg5[%c6_74, %c0_75] : memref<30x32xf32, #tpu.memory_space<vmem>>, vector<1x32xf32>
    %169 = vector.broadcast %168 : vector<1x32xf32> to vector<8x32xf32>
    %170 = arith.addf %167, %169 : vector<8x32xf32>
    %cst_76 = arith.constant dense<0.000000e+00> : vector<8xf32>
    %171 = vector.multi_reduction <add>, %170, %cst_76 [1] : vector<8x32xf32> to vector<8xf32>
    %172 = vector.shape_cast %171 : vector<8xf32> to vector<8x1xf32>
    %cst_77 = arith.constant 3.200000e+01 : f32
    %173 = vector.broadcast %cst_77 : f32 to vector<8x1xf32>
    %174 = arith.divf %172, %173 : vector<8x1xf32>
    %175 = vector.broadcast %174 : vector<8x1xf32> to vector<8x32xf32>
    %176 = arith.subf %170, %175 : vector<8x32xf32>
    %177 = arith.mulf %176, %176 : vector<8x32xf32>
    %cst_78 = arith.constant dense<0.000000e+00> : vector<8xf32>
    %178 = vector.multi_reduction <add>, %177, %cst_78 [1] : vector<8x32xf32> to vector<8xf32>
    %179 = vector.shape_cast %178 : vector<8xf32> to vector<8x1xf32>
    %cst_79 = arith.constant 3.200000e+01 : f32
    %180 = vector.broadcast %cst_79 : f32 to vector<8x1xf32>
    %181 = arith.divf %179, %180 : vector<8x1xf32>
    %c14 = arith.constant 14 : index
    %c0_80 = arith.constant 0 : index
    %182 = vector.load %arg5[%c14, %c0_80] : memref<30x32xf32, #tpu.memory_space<vmem>>, vector<1x32xf32>
    %c24 = arith.constant 24 : index
    %c0_81 = arith.constant 0 : index
    %183 = vector.load %arg5[%c24, %c0_81] : memref<30x32xf32, #tpu.memory_space<vmem>>, vector<1x32xf32>
    %184 = vector.broadcast %174 : vector<8x1xf32> to vector<8x32xf32>
    %185 = arith.subf %170, %184 : vector<8x32xf32>
    %cst_82 = arith.constant 9.99999974E-6 : f32
    %186 = vector.broadcast %cst_82 : f32 to vector<8x1xf32>
    %187 = arith.addf %181, %186 : vector<8x1xf32>
    %188 = math.rsqrt %187 : vector<8x1xf32>
    %189 = vector.broadcast %188 : vector<8x1xf32> to vector<8x32xf32>
    %190 = arith.mulf %185, %189 : vector<8x32xf32>
    %191 = vector.broadcast %182 : vector<1x32xf32> to vector<8x32xf32>
    %192 = arith.mulf %190, %191 : vector<8x32xf32>
    %193 = vector.broadcast %183 : vector<1x32xf32> to vector<8x32xf32>
    %194 = arith.addf %192, %193 : vector<8x32xf32>
    %cst_83 = arith.constant 0.000000e+00 : f32
    %195 = vector.broadcast %cst_83 : f32 to vector<8x32xf32>
    %196 = arith.maximumf %194, %195 : vector<8x32xf32>
    %c0_84 = arith.constant 0 : index
    %c0_85 = arith.constant 0 : index
    %197 = vector.load %arg6[%c0_84, %c0_85] : memref<32x96xf32, #tpu.memory_space<vmem>>, vector<32x96xf32>
    %cst_86 = arith.constant dense<0.000000e+00> : vector<8x96xf32>
    %198 = tpu.matmul %196, %197, %cst_86 {dimension_numbers = #tpu.dot_dimension_numbers<[1], [0], [0], [1], [0, 0, 1, 1], [], []>} : vector<8x32xf32>, vector<32x96xf32>, vector<8x96xf32> -> vector<8x96xf32>
    %c0_87 = arith.constant 0 : index
    %c0_88 = arith.constant 0 : index
    %199 = vector.load %arg7[%c0_87, %c0_88] : memref<1x96xf32, #tpu.memory_space<vmem>>, vector<1x96xf32>
    %200 = vector.broadcast %199 : vector<1x96xf32> to vector<8x96xf32>
    %201 = arith.addf %198, %200 : vector<8x96xf32>
    %202 = vector.extract_strided_slice %201 {offsets = [0, 0], sizes = [8, 32], strides = [1, 1]} : vector<8x96xf32> to vector<8x32xf32>
    %203 = vector.extract_strided_slice %201 {offsets = [0, 32], sizes = [8, 32], strides = [1, 1]} : vector<8x96xf32> to vector<8x32xf32>
    %204 = vector.extract_strided_slice %201 {offsets = [0, 64], sizes = [8, 32], strides = [1, 1]} : vector<8x96xf32> to vector<8x32xf32>
    %205 = tpu.iota {dimensions = array<i32: 1>} : vector<8x32xi32>
    %cst_89 = arith.constant 0.000000e+00 : f32
    %206 = vector.broadcast %cst_89 : f32 to vector<8x32xf32>
    %c0_i32 = arith.constant 0 : i32
    %207 = vector.broadcast %c0_i32 : i32 to vector<8x32xi32>
    %208 = arith.cmpi sge, %205, %207 : vector<8x32xi32>
    %c8_i32 = arith.constant 8 : i32
    %209 = vector.broadcast %c8_i32 : i32 to vector<8x32xi32>
    %210 = arith.cmpi slt, %205, %209 : vector<8x32xi32>
    %211 = arith.andi %208, %210 : vector<8x32xi1>
    %cst_90 = arith.constant 0.000000e+00 : f32
    %212 = vector.broadcast %cst_90 : f32 to vector<8x32xf32>
    %213 = arith.select %211, %202, %212 : vector<8x32xi1>, vector<8x32xf32>
    %cst_91 = arith.constant dense<0.000000e+00> : vector<8x8xf32>
    %214 = tpu.matmul %213, %203, %cst_91 {dimension_numbers = #tpu.dot_dimension_numbers<[1], [1], [0], [0], [0, 0, 1, 0], [], []>} : vector<8x32xf32>, vector<8x32xf32>, vector<8x8xf32> -> vector<8x8xf32>
    %cst_92 = arith.constant dense<0xFF800000> : vector<8xf32>
    %215 = vector.multi_reduction <maximumf>, %214, %cst_92 [1] : vector<8x8xf32> to vector<8xf32>
    %216 = vector.shape_cast %215 : vector<8xf32> to vector<8x1xf32>
    %217 = vector.broadcast %216 : vector<8x1xf32> to vector<8x8xf32>
    %218 = arith.subf %214, %217 : vector<8x8xf32>
    %219 = math.exp %218 : vector<8x8xf32>
    %cst_93 = arith.constant dense<0.000000e+00> : vector<8xf32>
    %220 = vector.multi_reduction <add>, %219, %cst_93 [1] : vector<8x8xf32> to vector<8xf32>
    %221 = vector.shape_cast %220 : vector<8xf32> to vector<8x1xf32>
    %222 = tpu.reciprocal %221 {approx = true} : vector<8x1xf32> -> vector<8x1xf32>
    %223 = vector.broadcast %222 : vector<8x1xf32> to vector<8x8xf32>
    %224 = arith.mulf %219, %223 : vector<8x8xf32>
    %cst_94 = arith.constant 0.000000e+00 : f32
    %225 = vector.broadcast %cst_94 : f32 to vector<8x32xf32>
    %226 = arith.select %211, %204, %225 : vector<8x32xi1>, vector<8x32xf32>
    %cst_95 = arith.constant dense<0.000000e+00> : vector<8x32xf32>
    %227 = tpu.matmul %224, %226, %cst_95 {dimension_numbers = #tpu.dot_dimension_numbers<[1], [0], [0], [1], [0, 0, 1, 1], [], []>} : vector<8x8xf32>, vector<8x32xf32>, vector<8x32xf32> -> vector<8x32xf32>
    %228 = arith.addf %206, %227 : vector<8x32xf32>
    %c8_i32_96 = arith.constant 8 : i32
    %229 = vector.broadcast %c8_i32_96 : i32 to vector<8x32xi32>
    %230 = arith.cmpi sge, %205, %229 : vector<8x32xi32>
    %c16_i32 = arith.constant 16 : i32
    %231 = vector.broadcast %c16_i32 : i32 to vector<8x32xi32>
    %232 = arith.cmpi slt, %205, %231 : vector<8x32xi32>
    %233 = arith.andi %230, %232 : vector<8x32xi1>
    %cst_97 = arith.constant 0.000000e+00 : f32
    %234 = vector.broadcast %cst_97 : f32 to vector<8x32xf32>
    %235 = arith.select %233, %202, %234 : vector<8x32xi1>, vector<8x32xf32>
    %cst_98 = arith.constant dense<0.000000e+00> : vector<8x8xf32>
    %236 = tpu.matmul %235, %203, %cst_98 {dimension_numbers = #tpu.dot_dimension_numbers<[1], [1], [0], [0], [0, 0, 1, 0], [], []>} : vector<8x32xf32>, vector<8x32xf32>, vector<8x8xf32> -> vector<8x8xf32>
    %cst_99 = arith.constant dense<0xFF800000> : vector<8xf32>
    %237 = vector.multi_reduction <maximumf>, %236, %cst_99 [1] : vector<8x8xf32> to vector<8xf32>
    %238 = vector.shape_cast %237 : vector<8xf32> to vector<8x1xf32>
    %239 = vector.broadcast %238 : vector<8x1xf32> to vector<8x8xf32>
    %240 = arith.subf %236, %239 : vector<8x8xf32>
    %241 = math.exp %240 : vector<8x8xf32>
    %cst_100 = arith.constant dense<0.000000e+00> : vector<8xf32>
    %242 = vector.multi_reduction <add>, %241, %cst_100 [1] : vector<8x8xf32> to vector<8xf32>
    %243 = vector.shape_cast %242 : vector<8xf32> to vector<8x1xf32>
    %244 = tpu.reciprocal %243 {approx = true} : vector<8x1xf32> -> vector<8x1xf32>
    %245 = vector.broadcast %244 : vector<8x1xf32> to vector<8x8xf32>
    %246 = arith.mulf %241, %245 : vector<8x8xf32>
    %cst_101 = arith.constant 0.000000e+00 : f32
    %247 = vector.broadcast %cst_101 : f32 to vector<8x32xf32>
    %248 = arith.select %233, %204, %247 : vector<8x32xi1>, vector<8x32xf32>
    %cst_102 = arith.constant dense<0.000000e+00> : vector<8x32xf32>
    %249 = tpu.matmul %246, %248, %cst_102 {dimension_numbers = #tpu.dot_dimension_numbers<[1], [0], [0], [1], [0, 0, 1, 1], [], []>} : vector<8x8xf32>, vector<8x32xf32>, vector<8x32xf32> -> vector<8x32xf32>
    %250 = arith.addf %228, %249 : vector<8x32xf32>
    %c16_i32_103 = arith.constant 16 : i32
    %251 = vector.broadcast %c16_i32_103 : i32 to vector<8x32xi32>
    %252 = arith.cmpi sge, %205, %251 : vector<8x32xi32>
    %c24_i32 = arith.constant 24 : i32
    %253 = vector.broadcast %c24_i32 : i32 to vector<8x32xi32>
    %254 = arith.cmpi slt, %205, %253 : vector<8x32xi32>
    %255 = arith.andi %252, %254 : vector<8x32xi1>
    %cst_104 = arith.constant 0.000000e+00 : f32
    %256 = vector.broadcast %cst_104 : f32 to vector<8x32xf32>
    %257 = arith.select %255, %202, %256 : vector<8x32xi1>, vector<8x32xf32>
    %cst_105 = arith.constant dense<0.000000e+00> : vector<8x8xf32>
    %258 = tpu.matmul %257, %203, %cst_105 {dimension_numbers = #tpu.dot_dimension_numbers<[1], [1], [0], [0], [0, 0, 1, 0], [], []>} : vector<8x32xf32>, vector<8x32xf32>, vector<8x8xf32> -> vector<8x8xf32>
    %cst_106 = arith.constant dense<0xFF800000> : vector<8xf32>
    %259 = vector.multi_reduction <maximumf>, %258, %cst_106 [1] : vector<8x8xf32> to vector<8xf32>
    %260 = vector.shape_cast %259 : vector<8xf32> to vector<8x1xf32>
    %261 = vector.broadcast %260 : vector<8x1xf32> to vector<8x8xf32>
    %262 = arith.subf %258, %261 : vector<8x8xf32>
    %263 = math.exp %262 : vector<8x8xf32>
    %cst_107 = arith.constant dense<0.000000e+00> : vector<8xf32>
    %264 = vector.multi_reduction <add>, %263, %cst_107 [1] : vector<8x8xf32> to vector<8xf32>
    %265 = vector.shape_cast %264 : vector<8xf32> to vector<8x1xf32>
    %266 = tpu.reciprocal %265 {approx = true} : vector<8x1xf32> -> vector<8x1xf32>
    %267 = vector.broadcast %266 : vector<8x1xf32> to vector<8x8xf32>
    %268 = arith.mulf %263, %267 : vector<8x8xf32>
    %cst_108 = arith.constant 0.000000e+00 : f32
    %269 = vector.broadcast %cst_108 : f32 to vector<8x32xf32>
    %270 = arith.select %255, %204, %269 : vector<8x32xi1>, vector<8x32xf32>
    %cst_109 = arith.constant dense<0.000000e+00> : vector<8x32xf32>
    %271 = tpu.matmul %268, %270, %cst_109 {dimension_numbers = #tpu.dot_dimension_numbers<[1], [0], [0], [1], [0, 0, 1, 1], [], []>} : vector<8x8xf32>, vector<8x32xf32>, vector<8x32xf32> -> vector<8x32xf32>
    %272 = arith.addf %250, %271 : vector<8x32xf32>
    %c24_i32_110 = arith.constant 24 : i32
    %273 = vector.broadcast %c24_i32_110 : i32 to vector<8x32xi32>
    %274 = arith.cmpi sge, %205, %273 : vector<8x32xi32>
    %c32_i32 = arith.constant 32 : i32
    %275 = vector.broadcast %c32_i32 : i32 to vector<8x32xi32>
    %276 = arith.cmpi slt, %205, %275 : vector<8x32xi32>
    %277 = arith.andi %274, %276 : vector<8x32xi1>
    %cst_111 = arith.constant 0.000000e+00 : f32
    %278 = vector.broadcast %cst_111 : f32 to vector<8x32xf32>
    %279 = arith.select %277, %202, %278 : vector<8x32xi1>, vector<8x32xf32>
    %cst_112 = arith.constant dense<0.000000e+00> : vector<8x8xf32>
    %280 = tpu.matmul %279, %203, %cst_112 {dimension_numbers = #tpu.dot_dimension_numbers<[1], [1], [0], [0], [0, 0, 1, 0], [], []>} : vector<8x32xf32>, vector<8x32xf32>, vector<8x8xf32> -> vector<8x8xf32>
    %cst_113 = arith.constant dense<0xFF800000> : vector<8xf32>
    %281 = vector.multi_reduction <maximumf>, %280, %cst_113 [1] : vector<8x8xf32> to vector<8xf32>
    %282 = vector.shape_cast %281 : vector<8xf32> to vector<8x1xf32>
    %283 = vector.broadcast %282 : vector<8x1xf32> to vector<8x8xf32>
    %284 = arith.subf %280, %283 : vector<8x8xf32>
    %285 = math.exp %284 : vector<8x8xf32>
    %cst_114 = arith.constant dense<0.000000e+00> : vector<8xf32>
    %286 = vector.multi_reduction <add>, %285, %cst_114 [1] : vector<8x8xf32> to vector<8xf32>
    %287 = vector.shape_cast %286 : vector<8xf32> to vector<8x1xf32>
    %288 = tpu.reciprocal %287 {approx = true} : vector<8x1xf32> -> vector<8x1xf32>
    %289 = vector.broadcast %288 : vector<8x1xf32> to vector<8x8xf32>
    %290 = arith.mulf %285, %289 : vector<8x8xf32>
    %cst_115 = arith.constant 0.000000e+00 : f32
    %291 = vector.broadcast %cst_115 : f32 to vector<8x32xf32>
    %292 = arith.select %277, %204, %291 : vector<8x32xi1>, vector<8x32xf32>
    %cst_116 = arith.constant dense<0.000000e+00> : vector<8x32xf32>
    %293 = tpu.matmul %290, %292, %cst_116 {dimension_numbers = #tpu.dot_dimension_numbers<[1], [0], [0], [1], [0, 0, 1, 1], [], []>} : vector<8x8xf32>, vector<8x32xf32>, vector<8x32xf32> -> vector<8x32xf32>
    %294 = arith.addf %272, %293 : vector<8x32xf32>
    %c7 = arith.constant 7 : index
    %c0_117 = arith.constant 0 : index
    %c0_118 = arith.constant 0 : index
    %295 = vector.load %arg4[%c7, %c0_117, %c0_118] : memref<12x32x32xf32, #tpu.memory_space<vmem>>, vector<1x32x32xf32>
    %296 = vector.shape_cast %295 : vector<1x32x32xf32> to vector<32x32xf32>
    %cst_119 = arith.constant dense<0.000000e+00> : vector<8x32xf32>
    %297 = tpu.matmul %294, %296, %cst_119 {dimension_numbers = #tpu.dot_dimension_numbers<[1], [0], [0], [1], [0, 0, 1, 1], [], []>} : vector<8x32xf32>, vector<32x32xf32>, vector<8x32xf32> -> vector<8x32xf32>
    %c7_120 = arith.constant 7 : index
    %c0_121 = arith.constant 0 : index
    %298 = vector.load %arg5[%c7_120, %c0_121] : memref<30x32xf32, #tpu.memory_space<vmem>>, vector<1x32xf32>
    %299 = vector.broadcast %298 : vector<1x32xf32> to vector<8x32xf32>
    %300 = arith.addf %297, %299 : vector<8x32xf32>
    %301 = arith.addf %196, %300 : vector<8x32xf32>
    %cst_122 = arith.constant dense<0.000000e+00> : vector<8xf32>
    %302 = vector.multi_reduction <add>, %301, %cst_122 [1] : vector<8x32xf32> to vector<8xf32>
    %303 = vector.shape_cast %302 : vector<8xf32> to vector<8x1xf32>
    %cst_123 = arith.constant 3.200000e+01 : f32
    %304 = vector.broadcast %cst_123 : f32 to vector<8x1xf32>
    %305 = arith.divf %303, %304 : vector<8x1xf32>
    %306 = vector.broadcast %305 : vector<8x1xf32> to vector<8x32xf32>
    %307 = arith.subf %301, %306 : vector<8x32xf32>
    %308 = arith.mulf %307, %307 : vector<8x32xf32>
    %cst_124 = arith.constant dense<0.000000e+00> : vector<8xf32>
    %309 = vector.multi_reduction <add>, %308, %cst_124 [1] : vector<8x32xf32> to vector<8xf32>
    %310 = vector.shape_cast %309 : vector<8xf32> to vector<8x1xf32>
    %cst_125 = arith.constant 3.200000e+01 : f32
    %311 = vector.broadcast %cst_125 : f32 to vector<8x1xf32>
    %312 = arith.divf %310, %311 : vector<8x1xf32>
    %c15 = arith.constant 15 : index
    %c0_126 = arith.constant 0 : index
    %313 = vector.load %arg5[%c15, %c0_126] : memref<30x32xf32, #tpu.memory_space<vmem>>, vector<1x32xf32>
    %c25 = arith.constant 25 : index
    %c0_127 = arith.constant 0 : index
    %314 = vector.load %arg5[%c25, %c0_127] : memref<30x32xf32, #tpu.memory_space<vmem>>, vector<1x32xf32>
    %315 = vector.broadcast %305 : vector<8x1xf32> to vector<8x32xf32>
    %316 = arith.subf %301, %315 : vector<8x32xf32>
    %cst_128 = arith.constant 9.99999974E-6 : f32
    %317 = vector.broadcast %cst_128 : f32 to vector<8x1xf32>
    %318 = arith.addf %312, %317 : vector<8x1xf32>
    %319 = math.rsqrt %318 : vector<8x1xf32>
    %320 = vector.broadcast %319 : vector<8x1xf32> to vector<8x32xf32>
    %321 = arith.mulf %316, %320 : vector<8x32xf32>
    %322 = vector.broadcast %313 : vector<1x32xf32> to vector<8x32xf32>
    %323 = arith.mulf %321, %322 : vector<8x32xf32>
    %324 = vector.broadcast %314 : vector<1x32xf32> to vector<8x32xf32>
    %325 = arith.addf %323, %324 : vector<8x32xf32>
    %c0_129 = arith.constant 0 : index
    %c0_130 = arith.constant 0 : index
    %326 = vector.load %arg8[%c0_129, %c0_130] : memref<32x64xf32, #tpu.memory_space<vmem>>, vector<32x64xf32>
    %cst_131 = arith.constant dense<0.000000e+00> : vector<8x64xf32>
    %327 = tpu.matmul %325, %326, %cst_131 {dimension_numbers = #tpu.dot_dimension_numbers<[1], [0], [0], [1], [0, 0, 1, 1], [], []>} : vector<8x32xf32>, vector<32x64xf32>, vector<8x64xf32> -> vector<8x64xf32>
    %c0_132 = arith.constant 0 : index
    %c0_133 = arith.constant 0 : index
    %328 = vector.load %arg9[%c0_132, %c0_133] : memref<1x64xf32, #tpu.memory_space<vmem>>, vector<1x64xf32>
    %329 = vector.broadcast %328 : vector<1x64xf32> to vector<8x64xf32>
    %330 = arith.addf %327, %329 : vector<8x64xf32>
    %cst_134 = arith.constant 0.000000e+00 : f32
    %331 = vector.broadcast %cst_134 : f32 to vector<8x64xf32>
    %332 = arith.maximumf %330, %331 : vector<8x64xf32>
    %c0_135 = arith.constant 0 : index
    %c0_136 = arith.constant 0 : index
    %333 = vector.load %arg10[%c0_135, %c0_136] : memref<64x32xf32, #tpu.memory_space<vmem>>, vector<64x32xf32>
    %cst_137 = arith.constant dense<0.000000e+00> : vector<8x32xf32>
    %334 = tpu.matmul %332, %333, %cst_137 {dimension_numbers = #tpu.dot_dimension_numbers<[1], [0], [0], [1], [0, 0, 1, 1], [], []>} : vector<8x64xf32>, vector<64x32xf32>, vector<8x32xf32> -> vector<8x32xf32>
    %c8 = arith.constant 8 : index
    %c0_138 = arith.constant 0 : index
    %335 = vector.load %arg5[%c8, %c0_138] : memref<30x32xf32, #tpu.memory_space<vmem>>, vector<1x32xf32>
    %336 = vector.broadcast %335 : vector<1x32xf32> to vector<8x32xf32>
    %337 = arith.addf %334, %336 : vector<8x32xf32>
    %338 = arith.addf %325, %337 : vector<8x32xf32>
    %cst_139 = arith.constant dense<0.000000e+00> : vector<8xf32>
    %339 = vector.multi_reduction <add>, %338, %cst_139 [1] : vector<8x32xf32> to vector<8xf32>
    %340 = vector.shape_cast %339 : vector<8xf32> to vector<8x1xf32>
    %cst_140 = arith.constant 3.200000e+01 : f32
    %341 = vector.broadcast %cst_140 : f32 to vector<8x1xf32>
    %342 = arith.divf %340, %341 : vector<8x1xf32>
    %343 = vector.broadcast %342 : vector<8x1xf32> to vector<8x32xf32>
    %344 = arith.subf %338, %343 : vector<8x32xf32>
    %345 = arith.mulf %344, %344 : vector<8x32xf32>
    %cst_141 = arith.constant dense<0.000000e+00> : vector<8xf32>
    %346 = vector.multi_reduction <add>, %345, %cst_141 [1] : vector<8x32xf32> to vector<8xf32>
    %347 = vector.shape_cast %346 : vector<8xf32> to vector<8x1xf32>
    %cst_142 = arith.constant 3.200000e+01 : f32
    %348 = vector.broadcast %cst_142 : f32 to vector<8x1xf32>
    %349 = arith.divf %347, %348 : vector<8x1xf32>
    %c16 = arith.constant 16 : index
    %c0_143 = arith.constant 0 : index
    %350 = vector.load %arg5[%c16, %c0_143] : memref<30x32xf32, #tpu.memory_space<vmem>>, vector<1x32xf32>
    %c26 = arith.constant 26 : index
    %c0_144 = arith.constant 0 : index
    %351 = vector.load %arg5[%c26, %c0_144] : memref<30x32xf32, #tpu.memory_space<vmem>>, vector<1x32xf32>
    %352 = vector.broadcast %342 : vector<8x1xf32> to vector<8x32xf32>
    %353 = arith.subf %338, %352 : vector<8x32xf32>
    %cst_145 = arith.constant 9.99999974E-6 : f32
    %354 = vector.broadcast %cst_145 : f32 to vector<8x1xf32>
    %355 = arith.addf %349, %354 : vector<8x1xf32>
    %356 = math.rsqrt %355 : vector<8x1xf32>
    %357 = vector.broadcast %356 : vector<8x1xf32> to vector<8x32xf32>
    %358 = arith.mulf %353, %357 : vector<8x32xf32>
    %359 = vector.broadcast %350 : vector<1x32xf32> to vector<8x32xf32>
    %360 = arith.mulf %358, %359 : vector<8x32xf32>
    %361 = vector.broadcast %351 : vector<1x32xf32> to vector<8x32xf32>
    %362 = arith.addf %360, %361 : vector<8x32xf32>
    %c0_146 = arith.constant 0 : index
    %c0_147 = arith.constant 0 : index
    %c0_148 = arith.constant 0 : index
    %363 = vector.load %arg12[%c0_146, %c0_147, %c0_148] : memref<1x8x32xf32, #tpu.memory_space<vmem>>, vector<1x8x32xf32>
    %364 = vector.shape_cast %363 : vector<1x8x32xf32> to vector<8x32xf32>
    %365 = vector.shape_cast %362 : vector<8x32xf32> to vector<1x8x32xf32>
    tpu.vector_store %arg12[%c0_146, %c0_147, %c0_148], %365 {strides = array<i32>} : memref<1x8x32xf32, #tpu.memory_space<vmem>>, vector<1x8x32xf32>,
    %c8_149 = arith.constant 8 : index
    %c0_150 = arith.constant 0 : index
    %c0_151 = arith.constant 0 : index
    %366 = vector.load %arg4[%c8_149, %c0_150, %c0_151] : memref<12x32x32xf32, #tpu.memory_space<vmem>>, vector<1x32x32xf32>
    %367 = vector.shape_cast %366 : vector<1x32x32xf32> to vector<32x32xf32>
    %cst_152 = arith.constant dense<0.000000e+00> : vector<8x32xf32>
    %368 = tpu.matmul %362, %367, %cst_152 {dimension_numbers = #tpu.dot_dimension_numbers<[1], [0], [0], [1], [0, 0, 1, 1], [], []>} : vector<8x32xf32>, vector<32x32xf32>, vector<8x32xf32> -> vector<8x32xf32>
    %cst_153 = arith.constant dense<0.000000e+00> : vector<8xf32>
    %369 = vector.multi_reduction <add>, %368, %cst_153 [1] : vector<8x32xf32> to vector<8xf32>
    %370 = vector.shape_cast %369 : vector<8xf32> to vector<8x1xf32>
    %cst_154 = arith.constant 3.200000e+01 : f32
    %371 = vector.broadcast %cst_154 : f32 to vector<8x1xf32>
    %372 = arith.divf %370, %371 : vector<8x1xf32>
    %373 = vector.broadcast %372 : vector<8x1xf32> to vector<8x32xf32>
    %374 = arith.subf %368, %373 : vector<8x32xf32>
    %375 = arith.mulf %374, %374 : vector<8x32xf32>
    %cst_155 = arith.constant dense<0.000000e+00> : vector<8xf32>
    %376 = vector.multi_reduction <add>, %375, %cst_155 [1] : vector<8x32xf32> to vector<8xf32>
    %377 = vector.shape_cast %376 : vector<8xf32> to vector<8x1xf32>
    %cst_156 = arith.constant 3.200000e+01 : f32
    %378 = vector.broadcast %cst_156 : f32 to vector<8x1xf32>
    %379 = arith.divf %377, %378 : vector<8x1xf32>
    %c17 = arith.constant 17 : index
    %c0_157 = arith.constant 0 : index
    %380 = vector.load %arg5[%c17, %c0_157] : memref<30x32xf32, #tpu.memory_space<vmem>>, vector<1x32xf32>
    %c27 = arith.constant 27 : index
    %c0_158 = arith.constant 0 : index
    %381 = vector.load %arg5[%c27, %c0_158] : memref<30x32xf32, #tpu.memory_space<vmem>>, vector<1x32xf32>
    %382 = vector.broadcast %372 : vector<8x1xf32> to vector<8x32xf32>
    %383 = arith.subf %368, %382 : vector<8x32xf32>
    %cst_159 = arith.constant 9.99999974E-6 : f32
    %384 = vector.broadcast %cst_159 : f32 to vector<8x1xf32>
    %385 = arith.addf %379, %384 : vector<8x1xf32>
    %386 = math.rsqrt %385 : vector<8x1xf32>
    %387 = vector.broadcast %386 : vector<8x1xf32> to vector<8x32xf32>
    %388 = arith.mulf %383, %387 : vector<8x32xf32>
    %389 = vector.broadcast %380 : vector<1x32xf32> to vector<8x32xf32>
    %390 = arith.mulf %388, %389 : vector<8x32xf32>
    %391 = vector.broadcast %381 : vector<1x32xf32> to vector<8x32xf32>
    %392 = arith.addf %390, %391 : vector<8x32xf32>
    %cst_160 = arith.constant 0.000000e+00 : f32
    %393 = vector.broadcast %cst_160 : f32 to vector<8x32xf32>
    %394 = arith.maximumf %392, %393 : vector<8x32xf32>
    %c9 = arith.constant 9 : index
    %c0_161 = arith.constant 0 : index
    %c0_162 = arith.constant 0 : index
    %395 = vector.load %arg4[%c9, %c0_161, %c0_162] : memref<12x32x32xf32, #tpu.memory_space<vmem>>, vector<1x32x32xf32>
    %396 = vector.shape_cast %395 : vector<1x32x32xf32> to vector<32x32xf32>
    %cst_163 = arith.constant dense<0.000000e+00> : vector<8x32xf32>
    %397 = tpu.matmul %394, %396, %cst_163 {dimension_numbers = #tpu.dot_dimension_numbers<[1], [0], [0], [1], [0, 0, 1, 1], [], []>} : vector<8x32xf32>, vector<32x32xf32>, vector<8x32xf32> -> vector<8x32xf32>
    %cst_164 = arith.constant dense<0.000000e+00> : vector<8xf32>
    %398 = vector.multi_reduction <add>, %397, %cst_164 [1] : vector<8x32xf32> to vector<8xf32>
    %399 = vector.shape_cast %398 : vector<8xf32> to vector<8x1xf32>
    %cst_165 = arith.constant 3.200000e+01 : f32
    %400 = vector.broadcast %cst_165 : f32 to vector<8x1xf32>
    %401 = arith.divf %399, %400 : vector<8x1xf32>
    %402 = vector.broadcast %401 : vector<8x1xf32> to vector<8x32xf32>
    %403 = arith.subf %397, %402 : vector<8x32xf32>
    %404 = arith.mulf %403, %403 : vector<8x32xf32>
    %cst_166 = arith.constant dense<0.000000e+00> : vector<8xf32>
    %405 = vector.multi_reduction <add>, %404, %cst_166 [1] : vector<8x32xf32> to vector<8xf32>
    %406 = vector.shape_cast %405 : vector<8xf32> to vector<8x1xf32>
    %cst_167 = arith.constant 3.200000e+01 : f32
    %407 = vector.broadcast %cst_167 : f32 to vector<8x1xf32>
    %408 = arith.divf %406, %407 : vector<8x1xf32>
    %c18 = arith.constant 18 : index
    %c0_168 = arith.constant 0 : index
    %409 = vector.load %arg5[%c18, %c0_168] : memref<30x32xf32, #tpu.memory_space<vmem>>, vector<1x32xf32>
    %c28 = arith.constant 28 : index
    %c0_169 = arith.constant 0 : index
    %410 = vector.load %arg5[%c28, %c0_169] : memref<30x32xf32, #tpu.memory_space<vmem>>, vector<1x32xf32>
    %411 = vector.broadcast %401 : vector<8x1xf32> to vector<8x32xf32>
    %412 = arith.subf %397, %411 : vector<8x32xf32>
    %cst_170 = arith.constant 9.99999974E-6 : f32
    %413 = vector.broadcast %cst_170 : f32 to vector<8x1xf32>
    %414 = arith.addf %408, %413 : vector<8x1xf32>
    %415 = math.rsqrt %414 : vector<8x1xf32>
    %416 = vector.broadcast %415 : vector<8x1xf32> to vector<8x32xf32>
    %417 = arith.mulf %412, %416 : vector<8x32xf32>
    %418 = vector.broadcast %409 : vector<1x32xf32> to vector<8x32xf32>
    %419 = arith.mulf %417, %418 : vector<8x32xf32>
    %420 = vector.broadcast %410 : vector<1x32xf32> to vector<8x32xf32>
    %421 = arith.addf %419, %420 : vector<8x32xf32>
    %cst_171 = arith.constant 0.000000e+00 : f32
    %422 = vector.broadcast %cst_171 : f32 to vector<8x32xf32>
    %423 = arith.maximumf %421, %422 : vector<8x32xf32>
    %c10_172 = arith.constant 10 : index
    %c0_173 = arith.constant 0 : index
    %c0_174 = arith.constant 0 : index
    %424 = vector.load %arg4[%c10_172, %c0_173, %c0_174] : memref<12x32x32xf32, #tpu.memory_space<vmem>>, vector<1x32x32xf32>
    %425 = vector.shape_cast %424 : vector<1x32x32xf32> to vector<32x32xf32>
    %cst_175 = arith.constant dense<0.000000e+00> : vector<8x32xf32>
    %426 = tpu.matmul %423, %425, %cst_175 {dimension_numbers = #tpu.dot_dimension_numbers<[1], [0], [0], [1], [0, 0, 1, 1], [], []>} : vector<8x32xf32>, vector<32x32xf32>, vector<8x32xf32> -> vector<8x32xf32>
    %cst_176 = arith.constant dense<0.000000e+00> : vector<8xf32>
    %427 = vector.multi_reduction <add>, %426, %cst_176 [1] : vector<8x32xf32> to vector<8xf32>
    %428 = vector.shape_cast %427 : vector<8xf32> to vector<8x1xf32>
    %cst_177 = arith.constant 3.200000e+01 : f32
    %429 = vector.broadcast %cst_177 : f32 to vector<8x1xf32>
    %430 = arith.divf %428, %429 : vector<8x1xf32>
    %431 = vector.broadcast %430 : vector<8x1xf32> to vector<8x32xf32>
    %432 = arith.subf %426, %431 : vector<8x32xf32>
    %433 = arith.mulf %432, %432 : vector<8x32xf32>
    %cst_178 = arith.constant dense<0.000000e+00> : vector<8xf32>
    %434 = vector.multi_reduction <add>, %433, %cst_178 [1] : vector<8x32xf32> to vector<8xf32>
    %435 = vector.shape_cast %434 : vector<8xf32> to vector<8x1xf32>
    %cst_179 = arith.constant 3.200000e+01 : f32
    %436 = vector.broadcast %cst_179 : f32 to vector<8x1xf32>
    %437 = arith.divf %435, %436 : vector<8x1xf32>
    %c19 = arith.constant 19 : index
    %c0_180 = arith.constant 0 : index
    %438 = vector.load %arg5[%c19, %c0_180] : memref<30x32xf32, #tpu.memory_space<vmem>>, vector<1x32xf32>
    %c29 = arith.constant 29 : index
    %c0_181 = arith.constant 0 : index
    %439 = vector.load %arg5[%c29, %c0_181] : memref<30x32xf32, #tpu.memory_space<vmem>>, vector<1x32xf32>
    %440 = vector.broadcast %430 : vector<8x1xf32> to vector<8x32xf32>
    %441 = arith.subf %426, %440 : vector<8x32xf32>
    %cst_182 = arith.constant 9.99999974E-6 : f32
    %442 = vector.broadcast %cst_182 : f32 to vector<8x1xf32>
    %443 = arith.addf %437, %442 : vector<8x1xf32>
    %444 = math.rsqrt %443 : vector<8x1xf32>
    %445 = vector.broadcast %444 : vector<8x1xf32> to vector<8x32xf32>
    %446 = arith.mulf %441, %445 : vector<8x32xf32>
    %447 = vector.broadcast %438 : vector<1x32xf32> to vector<8x32xf32>
    %448 = arith.mulf %446, %447 : vector<8x32xf32>
    %449 = vector.broadcast %439 : vector<1x32xf32> to vector<8x32xf32>
    %450 = arith.addf %448, %449 : vector<8x32xf32>
    %cst_183 = arith.constant 0.000000e+00 : f32
    %451 = vector.broadcast %cst_183 : f32 to vector<8x32xf32>
    %452 = arith.maximumf %450, %451 : vector<8x32xf32>
    %c11_184 = arith.constant 11 : index
    %c0_185 = arith.constant 0 : index
    %c0_186 = arith.constant 0 : index
    %453 = vector.load %arg4[%c11_184, %c0_185, %c0_186] : memref<12x32x32xf32, #tpu.memory_space<vmem>>, vector<1x32x32xf32>
    %454 = vector.shape_cast %453 : vector<1x32x32xf32> to vector<32x32xf32>
    %cst_187 = arith.constant dense<0.000000e+00> : vector<8x32xf32>
    %455 = tpu.matmul %452, %454, %cst_187 {dimension_numbers = #tpu.dot_dimension_numbers<[1], [0], [0], [1], [0, 0, 1, 1], [], []>} : vector<8x32xf32>, vector<32x32xf32>, vector<8x32xf32> -> vector<8x32xf32>
    %c9_188 = arith.constant 9 : index
    %c0_189 = arith.constant 0 : index
    %456 = vector.load %arg5[%c9_188, %c0_189] : memref<30x32xf32, #tpu.memory_space<vmem>>, vector<1x32xf32>
    %457 = vector.broadcast %456 : vector<1x32xf32> to vector<8x32xf32>
    %458 = arith.addf %455, %457 : vector<8x32xf32>
    %459 = arith.truncf %458 : vector<8x32xf32> to vector<8x32xbf16>
    %c0_190 = arith.constant 0 : index
    %c0_191 = arith.constant 0 : index
    %c0_192 = arith.constant 0 : index
    %460 = vector.load %arg2[%c0_190, %c0_191, %c0_192] : memref<1x32x256xf32, #tpu.memory_space<vmem>>, vector<1x32x256xf32>
    %461 = vector.shape_cast %460 : vector<1x32x256xf32> to vector<32x256xf32>
    %462 = arith.truncf %461 : vector<32x256xf32> to vector<32x256xbf16>
    %cst_193 = arith.constant dense<0.000000e+00> : vector<8x256xf32>
    %463 = tpu.matmul %459, %462, %cst_193 {dimension_numbers = #tpu.dot_dimension_numbers<[1], [0], [0], [1], [0, 0, 1, 1], [], []>} : vector<8x32xbf16>, vector<32x256xbf16>, vector<8x256xf32> -> vector<8x256xf32>
    %c0_194 = arith.constant 0 : index
    %c0_195 = arith.constant 0 : index
    %c0_196 = arith.constant 0 : index
    %464 = vector.load %arg11[%c0_194, %c0_195, %c0_196] : memref<1x8x256xf32, #tpu.memory_space<vmem>>, vector<1x8x256xf32>
    %465 = vector.shape_cast %464 : vector<1x8x256xf32> to vector<8x256xf32>
    %466 = vector.shape_cast %463 : vector<8x256xf32> to vector<1x8x256xf32>
    tpu.vector_store %arg11[%c0_194, %c0_195, %c0_196], %466 {strides = array<i32>} : memref<1x8x256xf32, #tpu.memory_space<vmem>>, vector<1x8x256xf32>,
    return
  }
  func.func @transform_0(%arg0: i32) -> (i32, i32, i32) {
    %c0_i32 = arith.constant 0 : i32
    %c0_i32_0 = arith.constant 0 : i32
    %c0_i32_1 = arith.constant 0 : i32
    return %arg0, %c0_i32, %c0_i32_0 : i32, i32, i32
  }
  func.func @transform_1(%arg0: i32) -> (i32, i32, i32) {
    %c0_i32 = arith.constant 0 : i32
    %c0_i32_0 = arith.constant 0 : i32
    %c0_i32_1 = arith.constant 0 : i32
    return %arg0, %c0_i32, %c0_i32_0 : i32, i32, i32
  }
  func.func @transform_2(%arg0: i32) -> (i32, i32, i32) {
    %c0_i32 = arith.constant 0 : i32
    %c0_i32_0 = arith.constant 0 : i32
    %c0_i32_1 = arith.constant 0 : i32
    return %arg0, %c0_i32, %c0_i32_0 : i32, i32, i32
  }
  func.func @transform_3(%arg0: i32) -> (i32, i32, i32) {
    %c0_i32 = arith.constant 0 : i32
    %c0_i32_0 = arith.constant 0 : i32
    %c0_i32_1 = arith.constant 0 : i32
    %c0_i32_2 = arith.constant 0 : i32
    return %c0_i32, %c0_i32_0, %c0_i32_1 : i32, i32, i32
  }
  func.func @transform_4(%arg0: i32) -> (i32, i32) {
    %c0_i32 = arith.constant 0 : i32
    %c0_i32_0 = arith.constant 0 : i32
    %c0_i32_1 = arith.constant 0 : i32
    return %c0_i32, %c0_i32_0 : i32, i32
  }
  func.func @transform_5(%arg0: i32) -> (i32, i32) {
    %c0_i32 = arith.constant 0 : i32
    %c0_i32_0 = arith.constant 0 : i32
    %c0_i32_1 = arith.constant 0 : i32
    return %c0_i32, %c0_i32_0 : i32, i32
  }
  func.func @transform_6(%arg0: i32) -> (i32, i32) {
    %c0_i32 = arith.constant 0 : i32
    %c0_i32_0 = arith.constant 0 : i32
    %c0_i32_1 = arith.constant 0 : i32
    return %c0_i32, %c0_i32_0 : i32, i32
  }
  func.func @transform_7(%arg0: i32) -> (i32, i32) {
    %c0_i32 = arith.constant 0 : i32
    %c0_i32_0 = arith.constant 0 : i32
    %c0_i32_1 = arith.constant 0 : i32
    return %c0_i32, %c0_i32_0 : i32, i32
  }
  func.func @transform_8(%arg0: i32) -> (i32, i32) {
    %c0_i32 = arith.constant 0 : i32
    %c0_i32_0 = arith.constant 0 : i32
    %c0_i32_1 = arith.constant 0 : i32
    return %c0_i32, %c0_i32_0 : i32, i32
  }
  func.func @transform_9(%arg0: i32) -> (i32, i32) {
    %c0_i32 = arith.constant 0 : i32
    %c0_i32_0 = arith.constant 0 : i32
    %c0_i32_1 = arith.constant 0 : i32
    return %c0_i32, %c0_i32_0 : i32, i32
  }
  func.func @transform_10(%arg0: i32) -> (i32, i32, i32) {
    %c0_i32 = arith.constant 0 : i32
    %c0_i32_0 = arith.constant 0 : i32
    %c0_i32_1 = arith.constant 0 : i32
    return %arg0, %c0_i32, %c0_i32_0 : i32, i32, i32
  }
  func.func @transform_11(%arg0: i32) -> (i32, i32, i32) {
    %c0_i32 = arith.constant 0 : i32
    %c0_i32_0 = arith.constant 0 : i32
    %c0_i32_1 = arith.constant 0 : i32
    return %arg0, %c0_i32, %c0_i32_0 : i32, i32, i32
  }
}

</mosaic_0001>

<bundles_post_ra>
// kernel: kernel_update_head_forward.1
= control target key start
LH: loop header
LB: loop body
LE: loop exit
PB: predicated region body
PF: predicated region fallthrough
CT: control target
= control target key end

     0   :  { %s4196_s0 = inlined_call_operand.vmem [shape: f32[2,8,256], index: 0, kind: input, shape index: {}]   ;;  %s4197_s1 = inlined_call_operand.vmem [shape: f32[2,32,256], index: 1, kind: input, shape index: {}]   ;;  %s4198_s2 = inlined_call_operand.vmem [shape: f32[2,8,32], index: 2, kind: input, shape index: {}]   ;;  %s4199_s3 = inlined_call_operand.vmem [shape: f32[12,32,32], index: 3, kind: input, shape index: {}]   ;;  %s4200_s4 = inlined_call_operand.vmem [shape: f32[30,32], index: 4, kind: input, shape index: {}]   ;;  %s4201_s5 = inlined_call_operand.vmem [shape: f32[32,96], index: 5, kind: input, shape index: {}]   ;;  %s4202_s6 = inlined_call_operand.vmem [shape: f32[1,96], index: 6, kind: input, shape index: {}]   ;;  %s4203_s7 = inlined_call_operand.vmem [shape: f32[32,64], index: 7, kind: input, shape index: {}]   ;;  %s4204_s8 = inlined_call_operand.vmem [shape: f32[1,64], index: 8, kind: input, shape index: {}]   ;;  %s4205_s9 = inlined_call_operand.vmem [shape: f32[64,32], index: 9, kind: input, shape index: {}]   ;;  %s4206_s10 = inlined_call_operand.vmem [shape: f32[2,8,256], index: 10, kind: output, shape index: {0}]   ;;  %s4207_s11 = inlined_call_operand.hbm [shape: f32[2,8,32], index: 11, kind: output, shape index: {1}]  }
   0x1   :  { %4210 = sst [smem:[#allocation6_spill]] %s4196_s0 }
   0x2   :  { %4211 = sst [smem:[#allocation7_spill]] %s4197_s1 }
   0x3   :  { %4212 = sst [smem:[#allocation8_spill]] %s4198_s2 }
   0x4   :  { %17 = vsyncpa [#allocation3], 0 }
   0x5   :  { %19 = vsyncpa [#allocation3 + $0x1], 0  ;;  %s3540_s17 = smov 0   ;;  %s3542_s18 = smov 0  }
   0x6   :  { %s3544_s19 = smov 0   ;;  %s3546_s20 = smov 0  }
   0x7 LB: > { %s3561_s21 = sadd.s32 4294967295, %s3472_s20   ;;  %s2879_s22 = sadd.s32 4294967294, %s3472_s20   ;;  %s3472_s20 = sphi %s3546_s20, %s4231_s20   ;;  %s3468_s19 = sphi %s3544_s19, %s4230_s19   ;;  %s3464_s18 = sphi %s3542_s18, %s4229_s18   ;;  %s3460_s17 = sphi %s3540_s17, %s4228_s17  }
   0x8   : > { %s3565_s23 = sadd.s32 1, %s3472_s20   ;;  %s283_s24 = sadd.s32 1, %s3468_s19 }
   0x9   : > { %s280_s25 = ssub.s32 %s3472_s20, %s3565_s23  ;;  %p293_p0 = scmp.ne.s32.totalorder %s3468_s19, %s3464_s18 }
   0xa   : > { %p281_p1 = scmp.eq.s32.totalorder %s280_s25, 0  ;;  %p294_p2 = scmp.eq.s32.totalorder %s3561_s21, 1 }
   0xb   : > { %p299_p3 = scmp.ne.s32.totalorder %s3464_s18, %s3460_s17  ;;  %p300_p4 = scmp.eq.s32.totalorder %s2879_s22, 1 }
   0xc   : > { %s3576_s26 = scalar_select %p281_p1, %s3468_s19, %s283_s24  }
   0xd   : > { %p3578_p5 = por %p294_p2, %p293_p0  ;;  %p3582_p6 = por %p300_p4, %p299_p3 }
   0xe   : > { %4213 = sst [smem:[#allocation5_spill]] %s3576_s26  ;;  %p2882_p7 = scmp.ge.s32.totalorder %s3472_s20, 1 }
   0xf   : > { %p362_p8 = scmp.lt.s32.totalorder %s3472_s20, 3 }
  0x11   : > { %p363_p9 = pnand %p2882_p7, %p362_p8 }
  0x12   : > { %p416_p10 = scmp.lt.s32.totalorder (!%p363_p9), %s3561_s21, 1  ;;  %s4216_s1 = sld [smem:[#allocation7_spill]] (!%p363_p9) }
  0x13   : > { %366 = sbr.rel (%p363_p9) target bundleno = 6185 (0x1829), region = 60  ;;  %s4217_s0 = sld [smem:[#allocation6_spill]] (!%p363_p9) }
  0x14   : > { %s4218_s2 = sld [smem:[#allocation8_spill]] (!%p363_p9)  ;;  %s3477_s16 = smov (!%p363_p9), 64  }
  0x15   : > { %s4209_s26 = sand.u32 (!%p363_p9), 1, %s3464_s18  }
  0x16   : > { %s4055_s12 = sshll.u32 (!%p363_p9), %s4209_s26, 3  ;;  %s3479_s26 = smov (!%p363_p9), [#allocation2]  }
  0x17   : > { %s3416_s29 = sshll.u32 (!%p363_p9), %s3479_s26, 4  ;;  %s3417_s29 = int_to_ptr.vmem [resolvable:$false] %s3416_s29 }
  0x18   : > { %v530_v0 = vld [vmem:[%s4199_s3 + $0x18] sm:$0xff]  ;;  %v3474_v1 = vmov 0.0   ;;  %v529_v2 = vld [vmem:[%s4199_s3 + $0x10] sm:$0xff]  ;;  %s3597_s14 = scalar_select %p416_p10, %s3561_s21, 1  ;;  %v528_v3 = vld [vmem:[%s4199_s3 + $0x8] sm:$0xff]  ;;  %vm3475_vm0 = vmmov 0  }
  0x19   : > { %3103 = vmatprep.subr.mxu1 %v3474_v1  ;;  %v527_v4 = vld [vmem:[%s4199_s3] sm:$0xff]  ;;  %3111 = vmatprep.mubr.msk.f32.mxu1 %vm3475_vm0, %v3474_v1  ;;  %vm536_vm1 = vcmask 261120   ;;  %v2896_v55 = vld [vmem:[%s4199_s3 + $0x38] sm:$0xff]  ;;  %v2895_v57 = vld [vmem:[%s4199_s3 + $0x30] sm:$0xff]  ;;  %vm1410_vm6 = vcmask 64512   ;;  %vm2194_vm13 = vcmask 523264  }
  0x1a   : > { %3104 = vmatpush3.msra.mxu1 %v530_v0  ;;  %s3006_s22 = sshll.u32 %s3597_s14, 6  ;;  %s4208_s24 = sshll.u32 %s3597_s14, 4  ;;  %v2894_v59 = vld [vmem:[%s4199_s3 + $0x28] sm:$0xff]  ;;  %v2893_v61 = vld [vmem:[%s4199_s3 + $0x20] sm:$0xff]  ;;  %v2902_v63 = vld [vmem:[%s4199_s3 + $0x58] sm:$0xff] }
  0x1b   : > { %3105 = vmatprep.subr.mxu1 %v3474_v1  ;;  %s3608_s30 = scalar_lea.vmem %s4216_s1, %s3006_s22  ;;  %s420_s15 = scalar_lea.vmem %s4217_s0, %s4208_s24  ;;  %v2901_v0 = vld [vmem:[%s4199_s3 + $0x50] sm:$0xff] }
  0x1c   : > { %3106 = vmatpush3.msra.mxu1 %v529_v2  ;;  %v479_v5 = vld [vmem:[%s3608_s30 + $0x28] sm:$0xff]  ;;  %v481_v6 = vld [vmem:[%s3608_s30 + $0x38] sm:$0xff]  ;;  %v478_v7 = vld [vmem:[%s3608_s30 + $0x20] sm:$0xff]  ;;  %s2888_s25 = sshll.u32 %s3597_s14, 3  ;;  %s3476_s0 = smov 96  }
  0x1d   : > { %3107 = vmatprep.subr.mxu1 %v3474_v1  ;;  %v485_v8 = vpack.c.bf16 %v481_v6, %v479_v5  ;;  %v480_v9 = vld [vmem:[%s3608_s30 + $0x30] sm:$0xff]  ;;  %v475_v10 = vld [vmem:[%s3608_s30 + $0x8] sm:$0xff]  ;;  %v477_v11 = vld [vmem:[%s3608_s30 + $0x18] sm:$0xff]  ;;  %s429_s22 = scalar_lea.vmem %s4218_s2, %s2888_s25  ;;  %s415_s24 = scalar_lea.vmem [#allocation2], %s4055_s12 }
  0x1e   : > { %3108 = vmatpush3.msra.mxu1 %v528_v3  ;;  %v484_v12 = vpack.c.bf16 %v480_v9, %v478_v7  ;;  %v483_v13 = vpack.c.bf16 %v477_v11, %v475_v10  ;;  %v436_v14 = vld [vmem:[%s420_s15] sm:$0xff]  ;;  %v437_v15 = vld [vmem:[%s420_s15 + $0x8] sm:$0xff]  ;;  %v476_v19 = vld [vmem:[%s3608_s30 + $0x10] sm:$0xff]  ;;  %s3002_s25 = sshll.u32 %s3561_s21, 7  ;;  %s3418_s2 = scalar_lea.vmem %s3417_s29, 256 }
  0x1f   : > { %3109 = vmatprep.subr.mxu1 %v3474_v1  ;;  %498 = vmatprep.subr.bf16.mxu0 %v485_v8  ;;  %v438_v16 = vrot.slane %v436_v14, 4  ;;  %v444_v17 = vrot.slane %v437_v15, 4  ;;  %v474_v18 = vld [vmem:[%s3608_s30] sm:$0xff]  ;;  %v2900_v2 = vld [vmem:[%s4199_s3 + $0x48] sm:$0xff]  ;;  %v2908_v5 = vld [vmem:[%s4199_s3 + $0x78] sm:$0xff]  ;;  %s2769_s15 = scalar_lea.hbm %s4207_s11, %s3002_s25 }
  0x20   : > { %3110 = vmatpush3.msra.mxu1 %v527_v4  ;;  %499 = vmatpush1.bf16.xpose.msra.mxu0 %v484_v12  ;;  %v482_v23 = vpack.c.bf16 %v476_v19, %v474_v18  ;;  %v2899_v3 = vld [vmem:[%s4199_s3 + $0x40] sm:$0xff]  ;;  %v2907_v6 = vld [vmem:[%s4199_s3 + $0x70] sm:$0xff]  ;;  %v2906_v7 = vld [vmem:[%s4199_s3 + $0x68] sm:$0xff] }
  0x21   : > { %3114 = vmatprep.subr.mxu1 %v3474_v1  ;;  %500 = vmatprep.subr.bf16.mxu0 %v483_v13  ;;  %v439_v20 = vmax.f32 %v436_v14, %v438_v16  ;;  %v445_v21 = vmax.f32 %v437_v15, %v444_v17  ;;  %v526_v4 = vld [vmem:[%s429_s22] sm:$0xff]  ;;  %v2914_v9 = vld [vmem:[%s4199_s3 + $0x98] sm:$0xff]  ;;  %v2913_v11 = vld [vmem:[%s4199_s3 + $0x90] sm:$0xff] }
  0x22   : > { %v2905_v8 = vld [vmem:[%s4199_s3 + $0x60] sm:$0xff]  ;;  %v2923_v10 = vld [vmem:[%s4199_s3 + $0xb8] sm:$0xff]  ;;  %v2922_v12 = vld [vmem:[%s4199_s3 + $0xb0] sm:$0xff] }
  0x23   : > { %v440_v22 = vrot.slane %v439_v20, 2  ;;  %v446_v24 = vrot.slane %v445_v21, 2  ;;  %v2912_v13 = vld [vmem:[%s4199_s3 + $0x88] sm:$0xff]  ;;  %v2920_v16 = vld [vmem:[%s4199_s3 + $0xa0] sm:$0xff] }
  0x24   : > { %v2897_v19 = vld [vmem:[%s4200_s4 + $0x1] ss:$0 sm:$0xff] }
  0x25   : > { %v441_v25 = vmax.f32 %v439_v20, %v440_v22  ;;  %v447_v26 = vmax.f32 %v445_v21, %v446_v24  ;;  %v2891_v24 = vld [vmem:[%s4200_s4] ss:$0 sm:$0xff] }
  0x27   : > { %v442_v27 = vrot.slane %v441_v25, 1  ;;  %v448_v28 = vrot.slane %v447_v26, 1 }
  0x28   : > { %501 = vmatpush1.bf16.xpose.msra.mxu0 %v482_v23 }
  0x29   : > { %v443_v29 = vmax.f32 %v441_v25, %v442_v27  ;;  %3147 = vmatprep.subr.mxu0 %v3474_v1  ;;  %v449_v30 = vmax.f32 %v447_v26, %v448_v28  ;;  %v2903_v25 = vld [vmem:[%s4200_s4 + $0x2] ss:$0 sm:$0xff] }
  0x2b   : > { %v450_v31 = vsub.f32 %v436_v14, %v443_v29  ;;  %v451_v32 = vsub.f32 %v437_v15, %v449_v30  ;;  %v2921_v14 = vld [vmem:[%s4199_s3 + $0xa8] sm:$0xff]  ;;  %v2911_v15 = vld [vmem:[%s4199_s3 + $0x80] sm:$0xff] }
  0x2d   : > { %v452_v33 = vmul.f32 1.442695, %v450_v31  ;;  %v454_v34 = vmul.f32 1.442695, %v451_v32  ;;  %v2909_v31 = vld [vmem:[%s4200_s4 + $0x3] ss:$0 sm:$0xff] }
  0x2f   : > { %3360 = vpow2.f32 %v452_v33 }
  0x30   : > { %3362 = vpow2.f32 %v454_v34 }
  0x3c   : > { %v3361_v35 = vpop.eup %3360 }
  0x3d   : > { %v3363_v36 = vpop.eup %3362  ;;  %v456_v37 = vrot.slane %v3361_v35, 4 }
  0x3e   : > { %v462_v38 = vrot.slane %v3363_v36, 4 }
  0x3f   : > { %v457_v39 = vadd.f32 %v3361_v35, %v456_v37 }
  0x40   : > { %v463_v40 = vadd.f32 %v3363_v36, %v462_v38  ;;  %v2924_v38 = vld [vmem:[%s4200_s4 + $0x5] ss:$0 sm:$0xff] }
  0x41   : > { %v458_v41 = vrot.slane %v457_v39, 2 }
  0x42   : > { %v464_v42 = vrot.slane %v463_v40, 2 }
  0x43   : > { %v459_v43 = vadd.f32 %v458_v41, %v457_v39 }
  0x44   : > { %v465_v44 = vadd.f32 %v464_v42, %v463_v40 }
  0x45   : > { %v460_v45 = vrot.slane %v459_v43, 1 }
  0x46   : > { %v466_v46 = vrot.slane %v465_v44, 1 }
  0x47   : > { %v461_v47 = vadd.f32 %v460_v45, %v459_v43 }
  0x48   : > { %v467_v48 = vadd.f32 %v466_v46, %v465_v44 }
  0x49   : > { %3364 = vrcp.f32 %v461_v47 }
  0x4a   : > { %3366 = vrcp.f32 %v467_v48 }
  0x56   : > { %v3365_v49 = vpop.eup %3364 }
  0x57   : > { %v3367_v50 = vpop.eup %3366  ;;  %v470_v51 = vmul.f32 %v3365_v49, %v3361_v35 }
  0x58   : > { %v471_v52 = vmul.f32 %v3367_v50, %v3363_v36  ;;  %v2915_v36 = vld [vmem:[%s4200_s4 + $0x4] ss:$0 sm:$0xff] }
  0x59   : > { %v472_v53 = vpack.c.bf16 %v470_v51, %v470_v51 }
  0x5a   : > { %v473_v54 = vpack.c.bf16 %v471_v52, %v471_v52 }
  0x5c   : > { %518 = vmatprep.mubr.bf16.mxu0 %v473_v54 }
  0x5d   : > { %519 = vmatmul.mubr.bf16.vlgmr.msra.gmra.mxu0 %v472_v53 }
  0x5e   : > { %3155 = vmatprep.mubr.msk.f32.mxu0 %vm3475_vm0, %v3474_v1  ;;  %3148 = vmatpush3.msra.mxu0 %v2914_v9 }
  0x5f   : > { %3149 = vmatprep.subr.mxu0 %v3474_v1 }
  0x60   : > { %3150 = vmatpush3.msra.mxu0 %v2913_v11 }
  0x61   : > { %3151 = vmatprep.subr.mxu0 %v3474_v1 }
  0x62   : > { %3152 = vmatpush3.msra.mxu0 %v2912_v13 }
  0x63   : > { %3153 = vmatprep.subr.mxu0 %v3474_v1 }
  0x64   : > { %3154 = vmatpush3.msra.mxu0 %v2911_v15 }
  0x65   : > { %3169 = vmatprep.subr.mxu0 %v3474_v1 }
 0x11d   : > { %v520_v56 = vpop.f32.mrf.mxu0 }
 0x11e   : > { %3112 = vmatmul.mubr.msk.f32.vlgmr.msra.gmra.mxu1 %vm536_vm1, %v520_v56 }
 0x11f   : > { %3115 = vmatpush3.msra.mxu1 %v2896_v55  ;;  %v522_v58 = vpop.f32.mrf.mxu0  ;;  %3122 = vmatprep.mubr.msk.f32.mxu1 %vm3475_vm0, %v3474_v1 }
 0x120   : > { %3116 = vmatprep.subr.mxu1 %v3474_v1 }
 0x121   : > { %3117 = vmatpush3.msra.mxu1 %v2895_v57  ;;  %v523_v60 = vpop.f32.mrf.mxu0 }
 0x122   : > { %3118 = vmatprep.subr.mxu1 %v3474_v1 }
 0x123   : > { %3119 = vmatpush3.msra.mxu1 %v2894_v59  ;;  %v524_v62 = vpop.f32.mrf.mxu0 }
 0x124   : > { %3120 = vmatprep.subr.mxu1 %v3474_v1 }
 0x125   : > { %3121 = vmatpush3.msra.mxu1 %v2893_v61 }
 0x126   : > { %3123 = vmatmul.mubr.msk.f32.vlgmr.msra.gmra.mxu1 %vm536_vm1, %v520_v56  ;;  %3125 = vmatprep.subr.mxu1 %v3474_v1 }
 0x127   : > { %3126 = vmatpush3.msra.mxu1 %v2902_v63  ;;  %3133 = vmatprep.mubr.msk.f32.mxu1 %vm3475_vm0, %v3474_v1 }
 0x128   : > { %3127 = vmatprep.subr.mxu1 %v3474_v1 }
 0x129   : > { %3128 = vmatpush3.msra.mxu1 %v2901_v0 }
 0x12a   : > { %3129 = vmatprep.subr.mxu1 %v3474_v1 }
 0x12b   : > { %3130 = vmatpush3.msra.mxu1 %v2900_v2 }
 0x12c   : > { %3131 = vmatprep.subr.mxu1 %v3474_v1 }
 0x12d   : > { %3132 = vmatpush3.msra.mxu1 %v2899_v3  ;;  %v2936_v3 = vld [vmem:[%s4199_s3 + $0xd8] sm:$0xff] }
 0x12e   : > { %3134 = vmatmul.mubr.msk.f32.vlgmr.msra.gmra.mxu1 %vm536_vm1, %v526_v4  ;;  %3136 = vmatprep.subr.mxu1 %v3474_v1 }
 0x12f   : > { %3137 = vmatpush3.msra.mxu1 %v2908_v5  ;;  %3144 = vmatprep.mubr.msk.f32.mxu1 %vm3475_vm0, %v3474_v1  ;;  %v2934_v5 = vld [vmem:[%s4199_s3 + $0xc8] sm:$0xff] }
 0x130   : > { %3138 = vmatprep.subr.mxu1 %v3474_v1 }
 0x131   : > { %3139 = vmatpush3.msra.mxu1 %v2907_v6  ;;  %v2933_v6 = vld [vmem:[%s4199_s3 + $0xc0] sm:$0xff] }
 0x132   : > { %3140 = vmatprep.subr.mxu1 %v3474_v1 }
 0x133   : > { %3141 = vmatpush3.msra.mxu1 %v2906_v7 }
 0x134   : > { %3142 = vmatprep.subr.mxu1 %v3474_v1 }
 0x135   : > { %3143 = vmatpush3.msra.mxu1 %v2905_v8 }
 0x136   : > { %3145 = vmatmul.mubr.msk.f32.vlgmr.msra.gmra.mxu1 %vm536_vm1, %v526_v4  ;;  %3158 = vmatprep.subr.mxu1 %v3474_v1  ;;  %v2935_v4 = vld [vmem:[%s4199_s3 + $0xd0] sm:$0xff] }
 0x137   : > { %3166 = vmatprep.mubr.msk.f32.mxu1 %vm3475_vm0, %v3474_v1  ;;  %3159 = vmatpush3.msra.mxu1 %v2923_v10 }
 0x138   : > { %3160 = vmatprep.subr.mxu1 %v3474_v1 }
 0x139   : > { %3161 = vmatpush3.msra.mxu1 %v2922_v12 }
 0x13a   : > { %3162 = vmatprep.subr.mxu1 %v3474_v1 }
 0x13b   : > { %3163 = vmatpush3.msra.mxu1 %v2921_v14  ;;  %v2917_v14 = vld [vmem:[%s4200_s4 + $0xa] ss:$0 sm:$0xff] }
 0x13c   : > { %3164 = vmatprep.subr.mxu1 %v3474_v1 }
 0x13d   : > { %3165 = vmatpush3.msra.mxu1 %v2920_v16  ;;  %v2918_v16 = vld [vmem:[%s4200_s4 + $0x14] ss:$0 sm:$0xff] }
 0x13e   : > { %3180 = vmatprep.subr.mxu1 %v3474_v1 }
 0x1de   : > { %v606_v17 = vpop.f32.mrf.mxu1 }
 0x1df   : > { %v607_v27 = vadd.f32 %v2891_v24, %v606_v17 }
 0x1e0   : > { %v3113_v18 = vpop.f32.mrf.mxu1 }
 0x1e6   : > { %v686_v20 = vpop.f32.mrf.mxu1 }
 0x1e7   : > { %v687_v21 = vadd.f32 %v2897_v19, %v686_v20  ;;  %v2926_v19 = vld [vmem:[%s4200_s4 + $0xb] ss:$0 sm:$0xff] }
 0x1e8   : > { %v3124_v22 = vpop.f32.mrf.mxu1 }
 0x1e9   : > { %v1080_v23 = vsel %vm536_vm1, %v687_v21, 0.0 }
 0x1ea   : > { %1081 = vadd.xlane.f32.xlu1 %v1080_v23  ;;  %v2927_v23 = vld [vmem:[%s4200_s4 + $0x15] ss:$0 sm:$0xff] }
 0x1ee   : > { %v769_v26 = vpop.f32.mrf.mxu1 }
 0x1ef   : > { %v770_v28 = vadd.f32 %v2903_v25, %v769_v26 }
 0x1f0   : > { %v3135_v29 = vpop.f32.mrf.mxu1 }
 0x1f1   : > { %v853_v30 = vmul.f32 %v770_v28, %v607_v27 }
 0x1f3   : > { %3156 = vmatmul.mubr.msk.f32.vlgmr.msra.gmra.mxu0 %vm536_vm1, %v853_v30  ;;  %3167 = vmatmul.mubr.msk.f32.vlgmr.msra.gmra.mxu1 %vm536_vm1, %v853_v30 }
 0x1f4   : > { %3177 = vmatprep.mubr.msk.f32.mxu0 %vm3475_vm0, %v3474_v1  ;;  %3188 = vmatprep.mubr.msk.f32.mxu1 %vm3475_vm0, %v3474_v1 }
 0x1f5   : > { %3170 = vmatpush3.msra.mxu0 %v2936_v3  ;;  %v1243_v3 = vld [vmem:[%s4201_s5 + $0x8] sm:$0xff] }
 0x1f6   : > { %v849_v32 = vpop.f32.mrf.mxu1  ;;  %3171 = vmatprep.subr.mxu0 %v3474_v1 }
 0x1f7   : > { %v850_v33 = vadd.f32 %v2909_v31, %v849_v32  ;;  %3172 = vmatpush3.msra.mxu0 %v2935_v4  ;;  %v1242_v4 = vld [vmem:[%s4201_s5] sm:$0xff] }
 0x1f8   : > { %v3146_v34 = vpop.f32.mrf.mxu1  ;;  %3173 = vmatprep.subr.mxu0 %v3474_v1 }
 0x1f9   : > { %v1105_v35 = vsel %vm536_vm1, %v850_v33, 0.0  ;;  %3174 = vmatpush3.msra.mxu0 %v2934_v5 }
 0x1fa   : > { %1106 = vadd.xlane.f32.xlu1 %v1105_v35  ;;  %3175 = vmatprep.subr.mxu0 %v3474_v1 }
 0x1fb   : > { %3176 = vmatpush3.msra.mxu0 %v2933_v6 }
 0x1fc   : > { %3191 = vmatprep.subr.mxu0 %v3474_v1 }
 0x273   : > { %v1082_v46 = vpop.xlane.xlu1 %1081 }
 0x274   : > { %v1083_v47 = vmul.f32 0.03125, %v1082_v46  ;;  %v2932_v46 = vld [vmem:[%s4200_s4 + $0x17] ss:$0 sm:$0xff] }
 0x276   : > { %v3758_v51 = vsub.f32 %v687_v21, %v1083_v47 }
 0x278   : > { %v1085_v60 = vmul.f32 %v3758_v51, %v3758_v51 }
 0x27a   : > { %v1086_v62 = vsel %vm536_vm1, %v1085_v60, 0.0 }
 0x283   : > { %v1107_v48 = vpop.xlane.xlu1 %1106 }
 0x284   : > { %v1108_v52 = vmul.f32 0.03125, %v1107_v48 }
 0x286   : > { %v3760_v57 = vsub.f32 %v850_v33, %v1108_v52 }
 0x288   : > { %v1110_v0 = vmul.f32 %v3760_v57, %v3760_v57 }
 0x28a   : > { %v1111_v2 = vsel %vm536_vm1, %v1110_v0, 0.0  ;;  %v1245_v0 = vld [vmem:[%s4201_s5 + $0x18] sm:$0xff] }
 0x28b   : > { %3181 = vmatpush3.msra.mxu1 %v1245_v0 }
 0x28c   : > { %3182 = vmatprep.subr.mxu1 %v3474_v1 }
 0x2b3   : > { %v933_v37 = vpop.f32.mrf.mxu0  ;;  %v1045_v39 = vpop.f32.mrf.mxu1 }
 0x2b4   : > { %v934_v40 = vadd.f32 %v2915_v36, %v933_v37  ;;  %v1046_v43 = vadd.f32 %v2924_v38, %v1045_v39 }
 0x2b5   : > { %v3157_v41 = vpop.f32.mrf.mxu0  ;;  %v3168_v42 = vpop.f32.mrf.mxu1 }
 0x2b6   : > { %v937_v44 = vsel %vm536_vm1, %v934_v40, 0.0  ;;  %v1049_v45 = vsel %vm536_vm1, %v1046_v43, 0.0  ;;  %v2929_v41 = vld [vmem:[%s4200_s4 + $0xc] ss:$0 sm:$0xff]  ;;  %v2931_v42 = vld [vmem:[%s4200_s4 + $0xd] ss:$0 sm:$0xff] }
 0x2b7   : > { %938 = vadd.xlane.f32.xlu0 %v937_v44 }
 0x2bb   : > { %1050 = vadd.xlane.f32.xlu0 %v1049_v45  ;;  %v2930_v45 = vld [vmem:[%s4200_s4 + $0x16] ss:$0 sm:$0xff] }
 0x340   : > { %v939_v49 = vpop.xlane.xlu0 %938 }
 0x341   : > { %v941_v50 = vmul.f32 0.03125, %v939_v49 }
 0x343   : > { %v942_v53 = vsub.f32 %v934_v40, %v941_v50 }
 0x344   : > { %v1051_v54 = vpop.xlane.xlu0 %1050 }
 0x345   : > { %v1052_v55 = vmul.f32 0.03125, %v1051_v54  ;;  %v943_v56 = vmul.f32 %v942_v53, %v942_v53  ;;  %v2937_v54 = vld [vmem:[%s4200_s4 + $0x6] ss:$0 sm:$0xff] }
 0x347   : > { %v1053_v58 = vsub.f32 %v1046_v43, %v1052_v55  ;;  %v944_v59 = vsel %vm536_vm1, %v943_v56, 0.0 }
 0x348   : > { %945 = vadd.xlane.f32.xlu0 %v944_v59 }
 0x349   : > { %v1054_v61 = vmul.f32 %v1053_v58, %v1053_v58 }
 0x34b   : > { %v1055_v63 = vsel %vm536_vm1, %v1054_v61, 0.0 }
 0x34c   : > { %1087 = vadd.xlane.f32.xlu0 %v1086_v62  ;;  %1056 = vadd.xlane.f32.xlu1 %v1055_v63 }
 0x350   : > { %1112 = vadd.xlane.f32.xlu1 %v1111_v2  ;;  %v1244_v2 = vld [vmem:[%s4201_s5 + $0x10] sm:$0xff] }
 0x351   : > { %3183 = vmatpush3.msra.mxu1 %v1244_v2 }
 0x352   : > { %3184 = vmatprep.subr.mxu1 %v3474_v1 }
 0x353   : > { %3185 = vmatpush3.msra.mxu1 %v1243_v3 }
 0x354   : > { %3186 = vmatprep.subr.mxu1 %v3474_v1 }
 0x355   : > { %3187 = vmatpush3.msra.mxu1 %v1242_v4 }
 0x356   : > { %3196 = vmatprep.subr.mxu1 %v3474_v1 }
 0x3d1   : > { %v946_v7 = vpop.xlane.xlu0 %945 }
 0x3d2   : > { %v947_v8 = vmul.f32 0.03125, %v946_v7 }
 0x3d4   : > { %v950_v9 = vadd.f32 1e-05, %v947_v8 }
 0x3d5   : > { %v1057_v10 = vpop.xlane.xlu1 %1056  ;;  %v1088_v22 = vpop.xlane.xlu0 %1087 }
 0x3d6   : > { %3368 = vrsqrt.f32 %v950_v9  ;;  %v1058_v11 = vmul.f32 0.03125, %v1057_v10  ;;  %v1089_v27 = vmul.f32 0.03125, %v1088_v22  ;;  %v2939_v9 = vld [vmem:[%s4200_s4 + $0xe] ss:$0 sm:$0xff] }
 0x3d8   : > { %v1061_v12 = vadd.f32 1e-05, %v1058_v11  ;;  %v1092_v31 = vadd.f32 1e-05, %v1089_v27  ;;  %v2940_v11 = vld [vmem:[%s4200_s4 + $0x18] ss:$0 sm:$0xff] }
 0x3d9   : > { %v1113_v24 = vpop.xlane.xlu1 %1112 }
 0x3da   : > { %3370 = vrsqrt.f32 %v1061_v12  ;;  %v1114_v29 = vmul.f32 0.03125, %v1113_v24 }
 0x3dc   : > { %v1117_v32 = vadd.f32 1e-05, %v1114_v29 }
 0x3e3   : > { %v3369_v13 = vpop.eup %3368 }
 0x3e4   : > { %v952_v15 = vmul.f32 %v3369_v13, %v942_v53 }
 0x3e6   : > { %v957_v17 = vmul.f32 %v2917_v14, %v952_v15  ;;  %v2941_v15 = vld [vmem:[%s4202_s6] ss:$0 sm:$0xff] }
 0x3e7   : > { %v3371_v18 = vpop.eup %3370 }
 0x3e8   : > { %v962_v20 = vadd.f32 %v2918_v16, %v957_v17  ;;  %v1063_v21 = vmul.f32 %v3371_v18, %v1053_v58 }
 0x3ea   : > { %v2919_v25 = vmul.f32 -1.442695, %v962_v20  ;;  %v1068_v26 = vmul.f32 %v2926_v19, %v1063_v21  ;;  %v1326_v19 = vlaneseq }
 0x3ec   : > { %3372 = vpow2.f32 %v2919_v25  ;;  %v1073_v28 = vadd.f32 %v2927_v23, %v1068_v26  ;;  %v1327_v20 = vand.u32 127, %v1326_v19  ;;  %v2960_v19 = vld [vmem:[%s4199_s3 + $0xe8] sm:$0xff] }
 0x3ee   : > { %v2928_v30 = vmul.f32 -1.442695, %v1073_v28  ;;  %vm1426_vm2 = vcmp.ge.s32.totalorder %v1327_v20, 8  ;;  %vm1427_vm3 = vcmp.lt.s32.totalorder %v1327_v20, 16  ;;  %vm1329_vm4 = vcmp.lt.s32.totalorder %v1327_v20, 8 }
 0x3ef   : > { %vm3856_vm5 = vmand %vm1426_vm2, %vm1427_vm3  ;;  %vm1661_vm7 = vcmp.ge.s32.totalorder %v1327_v20, 16  ;;  %vm1662_vm8 = vcmp.lt.s32.totalorder %v1327_v20, 24  ;;  %vm1824_vm10 = vcmp.ge.s32.totalorder %v1327_v20, 24  ;;  %vm1825_vm11 = vcmp.lt.s32.totalorder %v1327_v20, 32  ;;  %v2959_v20 = vld [vmem:[%s4199_s3 + $0xe0] sm:$0xff] }
 0x3f0   : > { %3374 = vpow2.f32 %v2928_v30  ;;  %vm3889_vm9 = vmand %vm1661_vm7, %vm1662_vm8 }
 0x3f1   : > { %3376 = vrsqrt.f32 %v1092_v31  ;;  %vm3901_vm12 = vmand %vm1824_vm10, %vm1825_vm11 }
 0x3f2   : > { %3378 = vrsqrt.f32 %v1117_v32 }
 0x3f9   : > { %v3373_v33 = vpop.eup %3372 }
 0x3fa   : > { %v966_v34 = vadd.f32 1.0, %v3373_v33 }
 0x3fc   : > { %3380 = vrcp.f32 %v966_v34 }
 0x3fd   : > { %v3375_v35 = vpop.eup %3374 }
 0x3fe   : > { %v1077_v36 = vadd.f32 1.0, %v3375_v35  ;;  %v3377_v37 = vpop.eup %3376 }
 0x3ff   : > { %v3379_v38 = vpop.eup %3378  ;;  %v1094_v39 = vmul.f32 %v3377_v37, %v3758_v51 }
 0x400   : > { %3382 = vrcp.f32 %v1077_v36  ;;  %v1119_v40 = vmul.f32 %v3379_v38, %v3760_v57 }
 0x401   : > { %v1099_v43 = vmul.f32 %v2929_v41, %v1094_v39 }
 0x402   : > { %v1124_v44 = vmul.f32 %v2931_v42, %v1119_v40  ;;  %v2098_v40 = vld [vmem:[%s4203_s7 + $0x10] sm:$0xff] }
 0x403   : > { %v1104_v48 = vadd.f32 %v2930_v45, %v1099_v43  ;;  %v2187_v42 = vld [vmem:[%s4205_s9 + $0x30] sm:$0xff] }
 0x404   : > { %v1129_v49 = vadd.f32 %v2932_v46, %v1124_v44 }
 0x409   : > { %v3381_v47 = vpop.eup %3380 }
 0x40a   : > { %v1131_v52 = vmul.f32 %v3381_v47, %v1129_v49 }
 0x40d   : > { %v3383_v50 = vpop.eup %3382 }
 0x40e   : > { %v1130_v51 = vmul.f32 %v3383_v50, %v1104_v48 }
 0x410   : > { %v1132_v53 = vadd.f32 %v1131_v52, %v1130_v51 }
 0x412   : > { %3178 = vmatmul.mubr.msk.f32.vlgmr.msra.gmra.mxu0 %vm536_vm1, %v1132_v53 }
 0x413   : > { %3193 = vmatprep.mubr.msk.f32.mxu0 %vm3475_vm0, %v3474_v1 }
 0x4d2   : > { %v1212_v55 = vpop.f32.mrf.mxu0 }
 0x4d3   : > { %v1213_v56 = vadd.f32 %v2937_v54, %v1212_v55 }
 0x4d4   : > { %v3179_v57 = vpop.f32.mrf.mxu0 }
 0x4d5   : > { %v1216_v58 = vsel %vm536_vm1, %v1213_v56, 0.0 }
 0x4d6   : > { %1217 = vadd.xlane.f32.xlu0 %v1216_v58 }
 0x55f   : > { %v1218_v59 = vpop.xlane.xlu0 %1217 }
 0x560   : > { %v1219_v60 = vmul.f32 0.03125, %v1218_v59 }
 0x562   : > { %v1220_v61 = vsub.f32 %v1213_v56, %v1219_v60 }
 0x564   : > { %v1221_v62 = vmul.f32 %v1220_v61, %v1220_v61 }
 0x566   : > { %v1222_v63 = vsel %vm536_vm1, %v1221_v62, 0.0 }
 0x567   : > { %1223 = vadd.xlane.f32.xlu1 %v1222_v63 }
 0x5f0   : > { %v1224_v5 = vpop.xlane.xlu1 %1223 }
 0x5f1   : > { %v1225_v6 = vmul.f32 0.03125, %v1224_v5 }
 0x5f3   : > { %v1228_v7 = vadd.f32 1e-05, %v1225_v6 }
 0x5f5   : > { %3384 = vrsqrt.f32 %v1228_v7 }
 0x602   : > { %v3385_v8 = vpop.eup %3384 }
 0x603   : > { %v1230_v10 = vmul.f32 %v3385_v8, %v1220_v61 }
 0x605   : > { %v1235_v12 = vmul.f32 %v2939_v9, %v1230_v10 }
 0x607   : > { %v3842_v13 = vadd.f32 %v2940_v11, %v1235_v12 }
 0x609   : > { %v1241_v14 = vmax.f32 %v3842_v13, 0.0  ;;  %v2097_v13 = vld [vmem:[%s4203_s7 + $0x8] sm:$0xff] }
 0x60b   : > { %3189 = vmatmul.mubr.msk.f32.vlgmr.msra.gmra.mxu1 %vm536_vm1, %v1241_v14 }
 0x60c   : > { %3198 = vmatprep.mubr.msk.f32.mxu1 %vm3475_vm0, %v3474_v1 }
 0x6cb   : > { %v1322_v16 = vpop.f32.mrf.mxu1 }
 0x6cc   : > { %v3853_v17 = vadd.f32 %v2941_v15, %v1322_v16 }
 0x6cd   : > { %v3190_v18 = vpop.f32.mrf.mxu1 }
 0x6ce   : > { %1333 = vrot.lane.b32.xlu0 %v3853_v17, %s3476_s0  ;;  %v1331_v23 = vsel %vm1329_vm4, %v3853_v17, 0.0  ;;  %v1429_v24 = vsel %vm3856_vm5, %v3853_v17, 0.0  ;;  %v1664_v41 = vsel %vm3889_vm9, %v3853_v17, 0.0  ;;  %v1827_v43 = vsel %vm3901_vm12, %v3853_v17, 0.0  ;;  %v2961_v18 = vld [vmem:[%s4199_s3 + $0xf0] sm:$0xff]  ;;  %s2771_s0 = sshll.u32 %s415_s24, 4  ;;  %s2772_s0 = int_to_ptr.vmem [resolvable:$true] %s2771_s0 }
 0x6cf   : > { %s3412_s1 = scalar_lea.vmem %s2772_s0, 128  ;;  %p3419_p0 = scmp.lt.s32.totalorder %s2772_s0, %s3417_s29 }
 0x6d0   : > { %p3413_p11 = scmp.ne.s32.totalorder %s2772_s0, %s3412_s1  ;;  %p3420_p1 = scmp.lt.s32.totalorder %s3418_s2, %s3412_s1 }
 0x6d2   : > { %p3414_p12 = pnand %p3413_p11, %p3578_p5  ;;  %p3421_p2 = por %p3420_p1, %p3419_p0 }
 0x6d4   : > { %p3415_p13 = pneg %p3414_p12 }
 0x6d6   : > { %p3422_p3 = pnand %p3421_p2, %p3415_p13 }
 0x740   : > { %v1334_v21 = vpop.permute.xlu0 %1333 }
 0x741   : > { %3192 = vmatpush3.xpose.msk.msra.mxu0 %vm536_vm1, %v1334_v21  ;;  %3197 = vmatpush3.xpose.msk.msra.mxu1 %vm536_vm1, %v1334_v21 }
 0x742   : > { %3201 = vmatprep.subr.mxu0 %v3474_v1  ;;  %3206 = vmatprep.subr.mxu1 %v3474_v1 }
 0x744   : > { %3194 = vmatmul.mubr.msk.f32.vlgmr.msra.gmra.mxu0 %vm536_vm1, %v1331_v23  ;;  %3199 = vmatmul.mubr.msk.f32.vlgmr.msra.gmra.mxu1 %vm536_vm1, %v1429_v24 }
 0x745   : > { %3203 = vmatprep.mubr.msk.f32.mxu0 %vm3475_vm0, %v3474_v1  ;;  %3208 = vmatprep.mubr.msk.f32.mxu1 %vm3475_vm0, %v3474_v1 }
 0x804   : > { %v1406_v25 = vpop.f32.mrf.mxu0  ;;  %v1499_v26 = vpop.f32.mrf.mxu1 }
 0x805   : > { %v1503_v27 = vsel %vm1410_vm6, %v1499_v26, -inf  ;;  %v1411_v28 = vsel %vm1410_vm6, %v1406_v25, -inf }
 0x806   : > { %1504 = vmax.xlane.f32.xlu1 %v1503_v27  ;;  %v3200_v29 = vpop.f32.mrf.mxu1  ;;  %1412 = vmax.xlane.f32.xlu0 %v1411_v28  ;;  %v3195_v30 = vpop.f32.mrf.mxu0  ;;  %v2963_v28 = vld [vmem:[%s4200_s4 + $0x7] ss:$0 sm:$0xff] }
 0x88f   : > { %v1505_v31 = vpop.xlane.xlu1 %1504  ;;  %v1413_v44 = vpop.xlane.xlu0 %1412 }
 0x890   : > { %v1506_v32 = vsub.f32 %v1499_v26, %v1505_v31  ;;  %v1414_v45 = vsub.f32 %v1406_v25, %v1413_v44  ;;  %v2185_v44 = vld [vmem:[%s4205_s9 + $0x20] sm:$0xff] }
 0x892   : > { %v1507_v33 = vmul.f32 1.442695, %v1506_v32  ;;  %v1415_v46 = vmul.f32 1.442695, %v1414_v45  ;;  %v2184_v45 = vld [vmem:[%s4205_s9 + $0x18] sm:$0xff] }
 0x894   : > { %3386 = vpow2.f32 %v1507_v33 }
 0x8a1   : > { %v3387_v34 = vpop.eup %3386 }
 0x8a2   : > { %v1509_v35 = vsel %vm1410_vm6, %v3387_v34, 0.0 }
 0x8a3   : > { %1510 = vadd.xlane.f32.xlu1 %v1509_v35 }
 0x8b4   : > { %1422 = vrot.lane.b32.xlu1 %v3853_v17, %s3477_s16  ;;  %v2962_v17 = vld [vmem:[%s4199_s3 + $0xf8] sm:$0xff]  ;;  %s4225_s16 = sand.u32 1, %s3464_s18  }
 0x8b5   : > { %s2755_s22 = scalar_lea.sflag [#allocation3], %s4225_s16 }
 0x92c   : > { %v1511_v36 = vpop.xlane.xlu1 %1510 }
 0x92d   : > { %3388 = vrcp.f32 %v1511_v36 }
 0x92e   : > { %3390 = vpow2.f32 %v1415_v46 }
 0x930   : > { %v3879_v37 = vpop.permute.xlu1 %1422 }
 0x931   : > { %3202 = vmatpush3.msk.msra.mxu0 %vm3856_vm5, %v3879_v37  ;;  %3207 = vmatpush3.msk.msra.mxu1 %vm1329_vm4, %v3879_v37 }
 0x932   : > { %3211 = vmatprep.subr.mxu0 %v3474_v1  ;;  %3216 = vmatprep.subr.mxu1 %v3474_v1 }
 0x93a   : > { %v3389_v38 = vpop.eup %3388 }
 0x93b   : > { %v1513_v39 = vmul.f32 %v3389_v38, %v3387_v34  ;;  %v3391_v54 = vpop.eup %3390 }
 0x93c   : > { %v1417_v56 = vsel %vm1410_vm6, %v3391_v54, 0.0 }
 0x93d   : > { %3204 = vmatmul.mubr.msk.f32.vlgmr.msra.gmra.mxu0 %vm1410_vm6, %v1513_v39  ;;  %v2099_v39 = vld [vmem:[%s4203_s7 + $0x18] sm:$0xff] }
 0x93e   : > { %3212 = vmatpush3.xpose.msk.msra.mxu0 %vm536_vm1, %v1334_v21  ;;  %3213 = vmatprep.mubr.msk.f32.mxu0 %vm3475_vm0, %v3474_v1 }
 0x93f   : > { %3221 = vmatprep.subr.mxu0 %v3474_v1 }
 0x941   : > { %3214 = vmatmul.mubr.msk.f32.vlgmr.msra.gmra.mxu0 %vm536_vm1, %v1664_v41  ;;  %v2188_v41 = vld [vmem:[%s4205_s9 + $0x38] sm:$0xff] }
 0x942   : > { %3222 = vmatpush3.xpose.msk.msra.mxu0 %vm536_vm1, %v1334_v21  ;;  %3223 = vmatprep.mubr.msk.f32.mxu0 %vm3475_vm0, %v3474_v1 }
 0x943   : > { %3231 = vmatprep.subr.mxu0 %v3474_v1 }
 0x945   : > { %3224 = vmatmul.mubr.msk.f32.vlgmr.msra.gmra.mxu0 %vm536_vm1, %v1827_v43  ;;  %v2186_v43 = vld [vmem:[%s4205_s9 + $0x28] sm:$0xff] }
 0x946   : > { %3239 = vmatprep.mubr.msk.f32.mxu0 %vm3475_vm0, %v3474_v1  ;;  %3232 = vmatpush3.msra.mxu0 %v2962_v17 }
 0x947   : > { %3233 = vmatprep.subr.mxu0 %v3474_v1 }
 0x948   : > { %3234 = vmatpush3.msra.mxu0 %v2961_v18 }
 0x949   : > { %3235 = vmatprep.subr.mxu0 %v3474_v1 }
 0x94a   : > { %3236 = vmatpush3.msra.mxu0 %v2960_v19 }
 0x94b   : > { %3237 = vmatprep.subr.mxu0 %v3474_v1 }
 0x94c   : > { %3238 = vmatpush3.msra.mxu0 %v2959_v20 }
 0x94d   : > { %3253 = vmatprep.subr.mxu0 %v3474_v1 }
 0x9fd   : > { %v3915_v47 = vpop.f32.mrf.mxu0 }
 0x9ff   : > { %v3205_v48 = vpop.f32.mrf.mxu0 }
 0xa01   : > { %v1734_v49 = vpop.f32.mrf.mxu0 }
 0xa02   : > { %v1738_v50 = vsel %vm1410_vm6, %v1734_v49, -inf }
 0xa03   : > { %1739 = vmax.xlane.f32.xlu1 %v1738_v50  ;;  %v3215_v51 = vpop.f32.mrf.mxu0  ;;  %v2965_v50 = vld [vmem:[%s4200_s4 + $0xf] ss:$0 sm:$0xff] }
 0xa05   : > { %v1897_v52 = vpop.f32.mrf.mxu0 }
 0xa06   : > { %v1901_v53 = vsel %vm1410_vm6, %v1897_v52, -inf }
 0xa07   : > { %1902 = vmax.xlane.f32.xlu0 %v1901_v53  ;;  %v3225_v55 = vpop.f32.mrf.mxu0 }
 0xa08   : > { %v2183_v55 = vld [vmem:[%s4205_s9 + $0x10] sm:$0xff] }
 0xa0b   : > { %1418 = vadd.xlane.f32.xlu0 %v1417_v56  ;;  %v2182_v56 = vld [vmem:[%s4205_s9 + $0x8] sm:$0xff] }
 0xa8c   : > { %v1740_v57 = vpop.xlane.xlu1 %1739 }
 0xa8d   : > { %v1741_v58 = vsub.f32 %v1734_v49, %v1740_v57  ;;  %v2181_v57 = vld [vmem:[%s4205_s9] sm:$0xff] }
 0xa8f   : > { %v1742_v59 = vmul.f32 1.442695, %v1741_v58  ;;  %v2967_v58 = vld [vmem:[%s4204_s8] ss:$0 sm:$0xff] }
 0xa90   : > { %v1903_v60 = vpop.xlane.xlu0 %1902 }
 0xa91   : > { %3392 = vpow2.f32 %v1742_v59  ;;  %v1904_v61 = vsub.f32 %v1897_v52, %v1903_v60  ;;  %v2966_v52 = vld [vmem:[%s4200_s4 + $0x19] ss:$0 sm:$0xff] }
 0xa93   : > { %v1905_v62 = vmul.f32 1.442695, %v1904_v61 }
 0xa94   : > { %v1419_v63 = vpop.xlane.xlu0 %1418 }
 0xa95   : > { %3394 = vpow2.f32 %v1905_v62 }
 0xa96   : > { %3396 = vrcp.f32 %v1419_v63  ;;  %v2969_v63 = vld [vmem:[%s4200_s4 + $0x8] ss:$0 sm:$0xff] }
 0xa9e   : > { %v3393_v0 = vpop.eup %3392 }
 0xa9f   : > { %v1744_v2 = vsel %vm1410_vm6, %v3393_v0, 0.0 }
 0xaa0   : > { %1745 = vadd.xlane.f32.xlu0 %v1744_v2 }
 0xaa2   : > { %v3395_v3 = vpop.eup %3394 }
 0xaa3   : > { %v3397_v4 = vpop.eup %3396  ;;  %v1907_v5 = vsel %vm1410_vm6, %v3395_v3, 0.0 }
 0xaa4   : > { %1908 = vadd.xlane.f32.xlu1 %v1907_v5  ;;  %v1421_v6 = vmul.f32 %v3397_v4, %v3391_v54 }
 0xaa6   : > { %3209 = vmatmul.mubr.msk.f32.vlgmr.msra.gmra.mxu1 %vm1410_vm6, %v1421_v6 }
 0xaa7   : > { %3217 = vmatpush3.msk.msra.mxu1 %vm3889_vm9, %v3879_v37  ;;  %3218 = vmatprep.mubr.msk.f32.mxu1 %vm3475_vm0, %v3474_v1 }
 0xaa8   : > { %3226 = vmatprep.subr.mxu1 %v3474_v1 }
 0xb29   : > { %v1746_v7 = vpop.xlane.xlu0 %1745 }
 0xb2a   : > { %3398 = vrcp.f32 %v1746_v7 }
 0xb2d   : > { %v1909_v8 = vpop.xlane.xlu1 %1908 }
 0xb2e   : > { %3400 = vrcp.f32 %v1909_v8 }
 0xb37   : > { %v3399_v9 = vpop.eup %3398 }
 0xb38   : > { %v1748_v10 = vmul.f32 %v3399_v9, %v3393_v0 }
 0xb3a   : > { %3219 = vmatmul.mubr.msk.f32.vlgmr.msra.gmra.mxu1 %vm1410_vm6, %v1748_v10 }
 0xb3b   : > { %v3401_v11 = vpop.eup %3400  ;;  %3227 = vmatpush3.msk.msra.mxu1 %vm3901_vm12, %v3879_v37  ;;  %3228 = vmatprep.mubr.msk.f32.mxu1 %vm3475_vm0, %v3474_v1 }
 0xb3c   : > { %v1911_v12 = vmul.f32 %v3401_v11, %v3395_v3  ;;  %3242 = vmatprep.subr.mxu1 %v3474_v1  ;;  %v2976_v11 = vld [vmem:[%s4199_s3 + $0x118] sm:$0xff] }
 0xb3e   : > { %3229 = vmatmul.mubr.msk.f32.vlgmr.msra.gmra.mxu1 %vm1410_vm6, %v1911_v12  ;;  %v2975_v12 = vld [vmem:[%s4199_s3 + $0x110] sm:$0xff] }
 0xb3f   : > { %3250 = vmatprep.mubr.msk.f32.mxu1 %vm3475_vm0, %v3474_v1  ;;  %3243 = vmatpush3.msra.mxu1 %v2099_v39 }
 0xb40   : > { %3244 = vmatprep.subr.mxu1 %v3474_v1 }
 0xb41   : > { %3245 = vmatpush3.msra.mxu1 %v2098_v40 }
 0xb42   : > { %3246 = vmatprep.subr.mxu1 %v3474_v1 }
 0xb43   : > { %3247 = vmatpush3.msra.mxu1 %v2097_v13 }
 0xb44   : > { %3248 = vmatprep.subr.mxu1 %v3474_v1 }
 0xb66   : > { %v1657_v15 = vpop.f32.mrf.mxu1 }
 0xb67   : > { %v1658_v22 = vadd.f32 %v1657_v15, %v3915_v47  ;;  %v2974_v15 = vld [vmem:[%s4199_s3 + $0x108] sm:$0xff] }
 0xb68   : > { %v3210_v16 = vpop.f32.mrf.mxu1 }
 0xb69   : > { %v2973_v16 = vld [vmem:[%s4199_s3 + $0x100] sm:$0xff] }
 0xbfa   : > { %v1819_v21 = vpop.f32.mrf.mxu1 }
 0xbfb   : > { %v1823_v24 = vadd.f32 %v1819_v21, %v1658_v22  ;;  %v2971_v21 = vld [vmem:[%s4200_s4 + $0x10] ss:$0 sm:$0xff] }
 0xbfc   : > { %v3220_v23 = vpop.f32.mrf.mxu1 }
 0xbfd   : > { %v2972_v23 = vld [vmem:[%s4200_s4 + $0x1a] ss:$0 sm:$0xff] }
 0xbfe   : > { %v1982_v25 = vpop.f32.mrf.mxu1 }
 0xbff   : > { %v1986_v26 = vadd.f32 %v1982_v25, %v1823_v24 }
 0xc00   : > { %v3230_v27 = vpop.f32.mrf.mxu1 }
 0xc01   : > { %3240 = vmatmul.mubr.msk.f32.vlgmr.msra.gmra.mxu0 %vm536_vm1, %v1986_v26 }
 0xc02   : > { %3269 = vmatprep.mubr.msk.f32.mxu0 %vm3475_vm0, %v3474_v1  ;;  %3254 = vmatpush3.msra.mxu0 %v2188_v41 }
 0xc03   : > { %3255 = vmatprep.subr.mxu0 %v3474_v1 }
 0xc04   : > { %3256 = vmatpush3.msra.mxu0 %v2187_v42  ;;  %v2979_v42 = vld [vmem:[%s4200_s4 + $0x1b] ss:$0 sm:$0xff] }
 0xc05   : > { %3257 = vmatprep.subr.mxu0 %v3474_v1 }
 0xc06   : > { %3258 = vmatpush3.msra.mxu0 %v2186_v43 }
 0xc07   : > { %3259 = vmatprep.subr.mxu0 %v3474_v1 }
 0xc08   : > { %3260 = vmatpush3.msra.mxu0 %v2185_v44 }
 0xc09   : > { %3261 = vmatprep.subr.mxu0 %v3474_v1 }
 0xc0a   : > { %3262 = vmatpush3.msra.mxu0 %v2184_v45 }
 0xc0b   : > { %3263 = vmatprep.subr.mxu0 %v3474_v1 }
 0xc0c   : > { %3264 = vmatpush3.msra.mxu0 %v2183_v55  ;;  %v2989_v55 = vld [vmem:[%s4199_s3 + $0x150] sm:$0xff] }
 0xc0d   : > { %3265 = vmatprep.subr.mxu0 %v3474_v1 }
 0xc0e   : > { %3266 = vmatpush3.msra.mxu0 %v2182_v56  ;;  %v2988_v56 = vld [vmem:[%s4199_s3 + $0x148] sm:$0xff] }
 0xc0f   : > { %3267 = vmatprep.subr.mxu0 %v3474_v1 }
 0xc10   : > { %3268 = vmatpush3.msra.mxu0 %v2181_v57  ;;  %v2987_v57 = vld [vmem:[%s4199_s3 + $0x140] sm:$0xff] }
 0xc11   : > { %3294 = vmatprep.subr.mxu0 %v3474_v1 }
 0xcc1   : > { %v2066_v29 = vpop.f32.mrf.mxu0 }
 0xcc2   : > { %v2067_v30 = vadd.f32 %v2963_v28, %v2066_v29 }
 0xcc3   : > { %v3241_v31 = vpop.f32.mrf.mxu0 }
 0xcc4   : > { %v2070_v32 = vadd.f32 %v2067_v30, %v1241_v14  ;;  %v2096_v14 = vld [vmem:[%s4203_s7] sm:$0xff] }
 0xcc5   : > { %3249 = vmatpush3.msra.mxu1 %v2096_v14  ;;  %v2978_v14 = vld [vmem:[%s4200_s4 + $0x11] ss:$0 sm:$0xff] }
 0xcc6   : > { %v2071_v33 = vsel %vm536_vm1, %v2070_v32, 0.0  ;;  %3272 = vmatprep.subr.mxu1 %v3474_v1 }
 0xcc7   : > { %2072 = vadd.xlane.f32.xlu0 %v2071_v33 }
 0xd50   : > { %v2073_v34 = vpop.xlane.xlu0 %2072 }
 0xd51   : > { %v2074_v35 = vmul.f32 0.03125, %v2073_v34  ;;  %v2983_v34 = vld [vmem:[%s4199_s3 + $0x138] sm:$0xff] }
 0xd53   : > { %v2075_v36 = vsub.f32 %v2070_v32, %v2074_v35  ;;  %v2982_v35 = vld [vmem:[%s4199_s3 + $0x130] sm:$0xff] }
 0xd55   : > { %v2076_v37 = vmul.f32 %v2075_v36, %v2075_v36 }
 0xd57   : > { %v2077_v38 = vsel %vm536_vm1, %v2076_v37, 0.0  ;;  %v2980_v37 = vld [vmem:[%s4199_s3 + $0x120] sm:$0xff] }
 0xd58   : > { %2078 = vadd.xlane.f32.xlu1 %v2077_v38 }
 0xde1   : > { %v2079_v46 = vpop.xlane.xlu1 %2078 }
 0xde2   : > { %v2080_v47 = vmul.f32 0.03125, %v2079_v46 }
 0xde4   : > { %v2083_v48 = vadd.f32 1e-05, %v2080_v47 }
 0xde6   : > { %3402 = vrsqrt.f32 %v2083_v48 }
 0xdf3   : > { %v3403_v49 = vpop.eup %3402 }
 0xdf4   : > { %v2085_v51 = vmul.f32 %v3403_v49, %v2075_v36  ;;  %v2981_v36 = vld [vmem:[%s4199_s3 + $0x128] sm:$0xff] }
 0xdf6   : > { %v2090_v53 = vmul.f32 %v2965_v50, %v2085_v51 }
 0xdf8   : > { %v2095_v54 = vadd.f32 %v2966_v52, %v2090_v53 }
 0xdfa   : > { %3251 = vmatmul.mubr.msk.f32.vlgmr.msra.gmra.mxu1 %vm536_vm1, %v2095_v54 }
 0xdfb   : > { %3280 = vmatprep.mubr.msk.f32.mxu1 %vm3475_vm0, %v3474_v1  ;;  %3273 = vmatpush3.msra.mxu1 %v2976_v11 }
 0xdfc   : > { %3274 = vmatprep.subr.mxu1 %v3474_v1 }
 0xdfd   : > { %3275 = vmatpush3.msra.mxu1 %v2975_v12 }
 0xdfe   : > { %3276 = vmatprep.subr.mxu1 %v3474_v1 }
 0xdff   : > { %3277 = vmatpush3.msra.mxu1 %v2974_v15  ;;  %v2997_v15 = vld [vmem:[%s4199_s3 + $0x178] sm:$0xff] }
 0xe00   : > { %3278 = vmatprep.subr.mxu1 %v3474_v1 }
 0xe01   : > { %3279 = vmatpush3.msra.mxu1 %v2973_v16  ;;  %v2996_v16 = vld [vmem:[%s4199_s3 + $0x170] sm:$0xff] }
 0xe02   : > { %3283 = vmatprep.subr.mxu1 %v3474_v1 }
 0xeba   : > { %v2176_v59 = vpop.f32.mrf.mxu1 }
 0xebb   : > { %v2177_v60 = vadd.f32 %v2967_v58, %v2176_v59 }
 0xebc   : > { %v3252_v61 = vpop.f32.mrf.mxu1 }
 0xebd   : > { %v2180_v62 = vmax.f32 %v2177_v60, 0.0 }
 0xebf   : > { %3270 = vmatmul.mubr.msk.f32.vlgmr.msra.gmra.mxu0 %vm2194_vm13, %v2180_v62  ;;  %v2985_v62 = vld [vmem:[%s4200_s4 + $0x12] ss:$0 sm:$0xff] }
 0xec0   : > { %3302 = vmatprep.mubr.msk.f32.mxu0 %vm3475_vm0, %v3474_v1 }
 0xf7f   : > { %v2264_v0 = vpop.f32.mrf.mxu0 }
 0xf80   : > { %v2265_v2 = vadd.f32 %v2969_v63, %v2264_v0  ;;  %v2986_v0 = vld [vmem:[%s4200_s4 + $0x1c] ss:$0 sm:$0xff] }
 0xf81   : > { %v3271_v3 = vpop.f32.mrf.mxu0 }
 0xf82   : > { %v2268_v4 = vadd.f32 %v2265_v2, %v2095_v54  ;;  %v2990_v54 = vld [vmem:[%s4199_s3 + $0x158] sm:$0xff] }
 0xf83   : > { %3295 = vmatpush3.msra.mxu0 %v2990_v54 }
 0xf84   : > { %v2269_v5 = vsel %vm536_vm1, %v2268_v4, 0.0  ;;  %3296 = vmatprep.subr.mxu0 %v3474_v1 }
 0xf85   : > { %2270 = vadd.xlane.f32.xlu0 %v2269_v5  ;;  %3297 = vmatpush3.msra.mxu0 %v2989_v55 }
 0xf86   : > { %3298 = vmatprep.subr.mxu0 %v3474_v1 }
 0xf87   : > { %3299 = vmatpush3.msra.mxu0 %v2988_v56 }
 0xf88   : > { %3300 = vmatprep.subr.mxu0 %v3474_v1 }
 0xf89   : > { %3301 = vmatpush3.msra.mxu0 %v2987_v57 }
0x100e   : > { %v2271_v6 = vpop.xlane.xlu0 %2270 }
0x100f   : > { %v2272_v7 = vmul.f32 0.03125, %v2271_v6 }
0x1011   : > { %v2273_v8 = vsub.f32 %v2268_v4, %v2272_v7 }
0x1013   : > { %v2274_v9 = vmul.f32 %v2273_v8, %v2273_v8 }
0x1015   : > { %v2275_v10 = vsel %vm536_vm1, %v2274_v9, 0.0 }
0x1016   : > { %2276 = vadd.xlane.f32.xlu1 %v2275_v10 }
0x109f   : > { %v2277_v17 = vpop.xlane.xlu1 %2276 }
0x10a0   : > { %v2278_v18 = vmul.f32 0.03125, %v2277_v17  ;;  %v2995_v17 = vld [vmem:[%s4199_s3 + $0x168] sm:$0xff] }
0x10a2   : > { %v2281_v19 = vadd.f32 1e-05, %v2278_v18  ;;  %v2994_v18 = vld [vmem:[%s4199_s3 + $0x160] sm:$0xff] }
0x10a4   : > { %3404 = vrsqrt.f32 %v2281_v19  ;;  %v2696_v19 = vld [vmem:[%s3608_s30 + $0x28] sm:$0xff] }
0x10b1   : > { %v3405_v20 = vpop.eup %3404 }
0x10b2   : > { %v2283_v22 = vmul.f32 %v3405_v20, %v2273_v8  ;;  %v2698_v20 = vld [vmem:[%s3608_s30 + $0x38] sm:$0xff] }
0x10b4   : > { %v2288_v24 = vmul.f32 %v2971_v21, %v2283_v22  ;;  %v2695_v21 = vld [vmem:[%s3608_s30 + $0x20] sm:$0xff]  ;;  %v2702_v22 = vpack.c.bf16 %v2698_v20, %v2696_v19 }
0x10b6   : > { %v2293_v25 = vadd.f32 %v2972_v23, %v2288_v24  ;;  %v2697_v23 = vld [vmem:[%s3608_s30 + $0x30] sm:$0xff]  ;;  %2718 = vmatprep.subr.bf16.mxu0 %v2702_v22 }
0x10b7   : > { %v2701_v24 = vpack.c.bf16 %v2697_v23, %v2695_v21 }
0x10b8   : > { %3281 = vmatmul.mubr.msk.f32.vlgmr.msra.gmra.mxu1 %vm536_vm1, %v2293_v25  ;;  %2294 = vst.msk [vmem:[%s415_s24] sm:$0xff] %vm536_vm1, %v2293_v25 }
0x10b9   : > { %3291 = vmatprep.mubr.msk.f32.mxu1 %vm3475_vm0, %v3474_v1  ;;  %3284 = vmatpush3.msra.mxu1 %v2983_v34  ;;  %v2692_v34 = vld [vmem:[%s3608_s30 + $0x8] sm:$0xff] }
0x10ba   : > { %3285 = vmatprep.subr.mxu1 %v3474_v1 }
0x10bb   : > { %3286 = vmatpush3.msra.mxu1 %v2982_v35  ;;  %v2694_v35 = vld [vmem:[%s3608_s30 + $0x18] sm:$0xff] }
0x10bc   : > { %3287 = vmatprep.subr.mxu1 %v3474_v1 }
0x10bd   : > { %3288 = vmatpush3.msra.mxu1 %v2981_v36  ;;  %v2700_v36 = vpack.c.bf16 %v2694_v35, %v2692_v34 }
0x10be   : > { %3289 = vmatprep.subr.mxu1 %v3474_v1 }
0x10bf   : > { %3290 = vmatpush3.msra.mxu1 %v2980_v37  ;;  %v2691_v37 = vld [vmem:[%s3608_s30] sm:$0xff] }
0x10c0   : > { %3305 = vmatprep.subr.mxu1 %v3474_v1 }
0x1178   : > { %v2369_v26 = vpop.f32.mrf.mxu1 }
0x1179   : > { %v2373_v27 = vsel %vm536_vm1, %v2369_v26, 0.0 }
0x117a   : > { %2374 = vadd.xlane.f32.xlu0 %v2373_v27  ;;  %v3282_v28 = vpop.f32.mrf.mxu1 }
0x1203   : > { %v2375_v29 = vpop.xlane.xlu0 %2374 }
0x1204   : > { %v2376_v30 = vmul.f32 0.03125, %v2375_v29 }
0x1206   : > { %v2377_v31 = vsub.f32 %v2369_v26, %v2376_v30  ;;  %v2993_v30 = vld [vmem:[%s4200_s4 + $0x1d] ss:$0 sm:$0xff] }
0x1208   : > { %v2378_v32 = vmul.f32 %v2377_v31, %v2377_v31 }
0x120a   : > { %v2379_v33 = vsel %vm536_vm1, %v2378_v32, 0.0 }
0x120b   : > { %2380 = vadd.xlane.f32.xlu1 %v2379_v33 }
0x1294   : > { %v2381_v38 = vpop.xlane.xlu1 %2380 }
0x1295   : > { %v2382_v39 = vmul.f32 0.03125, %v2381_v38  ;;  %v2693_v38 = vld [vmem:[%s3608_s30 + $0x10] sm:$0xff] }
0x1297   : > { %v2385_v40 = vadd.f32 1e-05, %v2382_v39  ;;  %v2699_v39 = vpack.c.bf16 %v2693_v38, %v2691_v37 }
0x1299   : > { %3406 = vrsqrt.f32 %v2385_v40  ;;  %v3478_v40 = vmov 0  }
0x12a6   : > { %v3407_v13 = vpop.eup %3406 }
0x12a7   : > { %v2387_v41 = vmul.f32 %v3407_v13, %v2377_v31  ;;  %v2998_v13 = vld [vmem:[%s4200_s4 + $0x9] ss:$0 sm:$0xff] }
0x12a9   : > { %v2392_v43 = vmul.f32 %v2978_v14, %v2387_v41 }
0x12ab   : > { %v2397_v44 = vadd.f32 %v2979_v42, %v2392_v43 }
0x12ad   : > { %v2398_v45 = vmax.f32 %v2397_v44, 0.0 }
0x12af   : > { %3292 = vmatmul.mubr.msk.f32.vlgmr.msra.gmra.mxu1 %vm536_vm1, %v2398_v45 }
0x12b0   : > { %3313 = vmatprep.mubr.msk.f32.mxu1 %vm3475_vm0, %v3474_v1  ;;  %3306 = vmatpush3.msra.mxu1 %v2997_v15 }
0x12b1   : > { %3307 = vmatprep.subr.mxu1 %v3474_v1 }
0x12b2   : > { %3308 = vmatpush3.msra.mxu1 %v2996_v16 }
0x12b3   : > { %3309 = vmatprep.subr.mxu1 %v3474_v1 }
0x12b4   : > { %3310 = vmatpush3.msra.mxu1 %v2995_v17 }
0x12b5   : > { %3311 = vmatprep.subr.mxu1 %v3474_v1  ;;  %v2992_v1 = vld [vmem:[%s4200_s4 + $0x13] ss:$0 sm:$0xff] }
0x12b6   : > { %3312 = vmatpush3.msra.mxu1 %v2994_v18 }
0x136f   : > { %v2473_v46 = vpop.f32.mrf.mxu1 }
0x1370   : > { %v2477_v47 = vsel %vm536_vm1, %v2473_v46, 0.0 }
0x1371   : > { %2478 = vadd.xlane.f32.xlu0 %v2477_v47  ;;  %v3293_v48 = vpop.f32.mrf.mxu1 }
0x13fa   : > { %v2479_v49 = vpop.xlane.xlu0 %2478 }
0x13fb   : > { %v2480_v50 = vmul.f32 0.03125, %v2479_v49 }
0x13fd   : > { %v2481_v51 = vsub.f32 %v2473_v46, %v2480_v50 }
0x13ff   : > { %v2482_v52 = vmul.f32 %v2481_v51, %v2481_v51 }
0x1401   : > { %v2483_v53 = vsel %vm536_vm1, %v2482_v52, 0.0 }
0x1402   : > { %2484 = vadd.xlane.f32.xlu1 %v2483_v53 }
0x148b   : > { %v2485_v58 = vpop.xlane.xlu1 %2484 }
0x148c   : > { %v2486_v59 = vmul.f32 0.03125, %v2485_v58 }
0x148e   : > { %v2489_v60 = vadd.f32 1e-05, %v2486_v59 }
0x1490   : > { %3408 = vrsqrt.f32 %v2489_v60 }
0x149d   : > { %v3409_v61 = vpop.eup %3408 }
0x149e   : > { %v2491_v63 = vmul.f32 %v3409_v61, %v2481_v51 }
0x14a0   : > { %v2496_v2 = vmul.f32 %v2985_v62, %v2491_v63 }
0x14a2   : > { %v2501_v3 = vadd.f32 %v2986_v0, %v2496_v2 }
0x14a4   : > { %v2502_v4 = vmax.f32 %v2501_v3, 0.0 }
0x14a6   : > { %3303 = vmatmul.mubr.msk.f32.vlgmr.msra.gmra.mxu0 %vm536_vm1, %v2502_v4 }
0x14a7   : > { %2719 = vmatpush1.bf16.msra.mxu0 %v2701_v24  ;;  %2738 = vmatprep.mubr.bf16.mxu0 %v3478_v40 }
0x14a8   : > { %2720 = vmatprep.subr.bf16.mxu0 %v2700_v36 }
0x14ab   : > { %2721 = vmatpush1.bf16.msra.mxu0 %v2699_v39 }
0x1566   : > { %v2577_v5 = vpop.f32.mrf.mxu0 }
0x1567   : > { %v2581_v6 = vsel %vm536_vm1, %v2577_v5, 0.0 }
0x1568   : > { %2582 = vadd.xlane.f32.xlu0 %v2581_v6  ;;  %v3304_v7 = vpop.f32.mrf.mxu0 }
0x15f1   : > { %v2583_v8 = vpop.xlane.xlu0 %2582 }
0x15f2   : > { %v2584_v9 = vmul.f32 0.03125, %v2583_v8 }
0x15f4   : > { %v2585_v10 = vsub.f32 %v2577_v5, %v2584_v9 }
0x15f6   : > { %v2586_v11 = vmul.f32 %v2585_v10, %v2585_v10 }
0x15f8   : > { %v2587_v12 = vsel %vm536_vm1, %v2586_v11, 0.0 }
0x15f9   : > { %2588 = vadd.xlane.f32.xlu1 %v2587_v12 }
0x1682   : > { %v2589_v25 = vpop.xlane.xlu1 %2588 }
0x1683   : > { %v2590_v26 = vmul.f32 0.03125, %v2589_v25 }
0x1685   : > { %v2593_v27 = vadd.f32 1e-05, %v2590_v26 }
0x1687   : > { %3410 = vrsqrt.f32 %v2593_v27 }
0x1694   : > { %v3411_v28 = vpop.eup %3410 }
0x1695   : > { %v2595_v29 = vmul.f32 %v3411_v28, %v2585_v10 }
0x1697   : > { %v2600_v31 = vmul.f32 %v2992_v1, %v2595_v29 }
0x1699   : > { %v2605_v32 = vadd.f32 %v2993_v30, %v2600_v31 }
0x169b   : > { %v2606_v33 = vmax.f32 %v2605_v32, 0.0 }
0x169d   : > { %3314 = vmatmul.mubr.msk.f32.vlgmr.msra.gmra.mxu1 %vm536_vm1, %v2606_v33 }
0x175d   : > { %v2686_v14 = vpop.f32.mrf.mxu1 }
0x175e   : > { %v2687_v41 = vadd.f32 %v2998_v13, %v2686_v14 }
0x175f   : > { %v3315_v42 = vpop.f32.mrf.mxu1 }
0x1760   : > { %v2690_v43 = vpack.c.bf16 %v2687_v41, %v2687_v41 }
0x1762   : > { %3000 = vmatmul.mubr.msk.bf16.vlgmr.msra.gmra.mxu0 %vm536_vm1, %v2690_v43 }
0x1763   : > { %3425 = shalt.err (!%p3422_p3)
}
0x1764   : > { %s3426_s21 = scalar_lea.hbm %s2769_s15, 128  ;;  %s3430_s25 = scalar_lea.hbm %s4207_s11, 256 }
0x1765   : > { %p3427_p4 = scmp.ne.s32.totalorder %s2769_s15, %s3426_s21  ;;  %p3431_p9 = scmp.lt.s32.totalorder %s2769_s15, %s4207_s11 }
0x1766   : > { %p3432_p10 = scmp.lt.s32.totalorder %s3430_s25, %s3426_s21 }
0x1767   : > { %p3428_p7 = pnand %p3427_p4, %p3578_p5 }
0x1768   : > { %p3433_p11 = por %p3432_p10, %p3431_p9 }
0x1769   : > { %p3429_p8 = pneg %p3428_p7 }
0x176b   : > { %p3434_p12 = pnand %p3433_p11, %p3429_p8 }
0x176d   : > { %3437 = shalt.err (!%p3434_p12)
}
0x176e   : > { %3316 = dma.vmem_to_hbm [thread:$0]  (%p3578_p5), %s2772_s0, 128, %s2769_s15, %s2755_s22  }
0x176f   : > { %s4226_s1 = sshll.u32 %s3597_s14, 4 }
0x1770   : > { %s434_s26 = scalar_lea.vmem %s4206_s10, %s4226_s1 }
0x1822   : > { %v2740_v44 = vpop.f32.mrf.mxu0 }
0x1823   : > { %2747 = vst [vmem:[%s434_s26] sm:$0xff] %v2740_v44 }
0x1824   : > { %v2742_v45 = vpop.f32.mrf.mxu0 }
0x1825   : > { %2748 = vst [vmem:[%s434_s26 + $0x8] sm:$0xff] %v2742_v45 }
0x1826   : > { %v2744_v46 = vpop.f32.mrf.mxu0 }
0x1828   : > { %v2745_v47 = vpop.f32.mrf.mxu0 }
0x1829 PF: > { %p3322_p13 = scmp.ge.s32.totalorder %s3472_s20, 2  ;;  %s2791_s29 = sand.u32 1, %s3460_s17  }
0x182a   : > { %s2792_s27 = scalar_lea.sflag [#allocation3], %s2791_s29 }
0x182b   : > { %p3319_p0 = pnand %p3322_p13, %p3582_p6 }
0x182d   : > { %p3320_p5 = pneg %p3319_p0 }
0x182f   : > { %3455 = dma.done.wait (%p3320_p5), %s2792_s27, 128  }
0x1830   : > { %3457 = vsyncadd (%p3320_p5), %s2792_s27, 4294967168  ;;  %s4227_s14 = sld [smem:[#allocation5_spill]]  ;;  %p22_p1 = scmp.ge.s32.totalorder %s3565_s23, 4  }
0x1831   : > { %s4228_s17 = smov %s3464_s18  ;;  %s4229_s18 = smov %s3468_s19 }
0x1832   : > { %s4231_s20 = smov %s3565_s23  ;;  %24 = sbr.rel (!%p22_p1) target bundleno = 7 (0x7), region = 124 }
0x1836   : > { %s4230_s19 = smov %s4227_s14 }
0x1837   :  { %2797 = vsyncpa [#allocation3], 1 }
0x1838   :  { %2799 = vsyncpa [#allocation3 + $0x1], 1 }

</bundles_post_ra>
